<compile_context>
chip_gen: v7x
topology: tpu7x:2x2x1
jax: 0.10.0
libtpu: 0.0.40
codegen_flags: <defaults>
</compile_context>

<pallas_src>
import functools

import jax
import jax.numpy as jnp
from jax.experimental import pallas as pl
from jax.experimental.pallas import tpu as pltpu


# ----------------------------------------------------------------------------
# Kernels
# ----------------------------------------------------------------------------
def _fc_kernel(z_ref, w_ref, o_ref):
    # First layer: ConvTranspose2d(nz, C1, 4, 1, 0) on a 1x1 input is a plain
    # matmul  (B, nz) @ (nz, C1*16)  -> lane-dense (B, C1*16) output.
    o_ref[...] = jnp.dot(z_ref[...], w_ref[...],
                         preferred_element_type=jnp.float32).astype(o_ref.dtype)


def _upconv_phase_kernel(x_ref, scale_ref, shift_ref, mask_ref, w_ref, o_ref,
                         *, H, W, out_act):
    # x_ref:     (1, Cin, L)        flattened, spatially-padded RAW conv output
    #                               of the previous layer (L = (H+2)*(W+2) + 2)
    # scale_ref: (Cin, 1)           folded BatchNorm scale  (gamma * rsqrt(var+eps))
    # shift_ref: (Cin, 1)           folded BatchNorm shift  (beta - mean*scale)
    # mask_ref:  (1, L)             1.0 on real pixels, 0.0 on padding/margins
    # w_ref:     (4, Cout, 4*Cin)   per-phase 2x2 sub-filters, im2col order
    # o_ref:     (1, 4, Cout, H*Wp) per-phase outputs, spatial on the lane axis
    Wp = W + 2
    HWp = H * Wp

    x = x_ref[0]                                                  # (Cin, L)
    # Fused BN affine + ReLU on the input; padding must be zero in activation
    # space, so the mask re-zeroes the padded / margin positions.
    xa = jnp.maximum(x * scale_ref[...] + shift_ref[...], 0.0) * mask_ref[...]

    # 9 shifted windows (r, c in {0,1,2}) as static contiguous lane slices.
    win = {}
    for r in range(3):
        for c in range(3):
            s = r * Wp + c
            win[(r, c)] = xa[:, s:s + HWp]                        # (Cin, H*Wp)

    # One MXU matmul per output phase: (Cout, 4Cin) x (4Cin, H*Wp).
    for dy in range(2):
        for dx in range(2):
            ph = 2 * dy + dx
            cat = jnp.concatenate(
                [win[(dy + a, dx + b)] for a in range(2) for b in range(2)],
                axis=0)                                           # (4Cin, H*Wp)
            acc = jnp.dot(w_ref[ph], cat,
                          preferred_element_type=jnp.float32)     # (Cout, H*Wp)
            if out_act == "tanh":
                acc = jnp.tanh(acc)
            o_ref[0, ph] = acc.astype(o_ref.dtype)


# ----------------------------------------------------------------------------
# Wrappers
# ----------------------------------------------------------------------------
def _phase_weights(wt):
    """ConvTranspose2d weight (Cin, Cout, 4, 4) -> (4, Cout, 4*Cin) phase filters.

    out[o, 2m+dy, 2n+dx] = sum_{i,a,b} xpad[i, m+dy+a, n+dx+b] * wt[i, o, 3-dy-2a, 3-dx-2b]
    """
    phases = []
    for dy in range(2):
        for dx in range(2):
            taps = []
            for a in range(2):
                for b in range(2):
                    taps.append(wt[:, :, 3 - dy - 2 * a, 3 - dx - 2 * b].T)  # (Cout, Cin)
            phases.append(jnp.concatenate(taps, axis=1))                     # (Cout, 4Cin)
    return jnp.stack(phases, axis=0)                                         # (4, Cout, 4Cin)


def _bn_scale_shift(x_raw, gamma, beta, eps=1e-5):
    """Training-mode BatchNorm2d folded to per-channel scale / shift."""
    mean = jnp.mean(x_raw, axis=(0, 2, 3))
    var = jnp.var(x_raw, axis=(0, 2, 3))          # biased, as PyTorch uses for normalization
    scale = gamma * jax.lax.rsqrt(var + eps)
    shift = beta - mean * scale
    return scale.reshape(-1, 1), shift.reshape(-1, 1)


def _input_projection(z, w1):
    """ConvTranspose2d(nz, C1, 4, 1, 0) on (B, nz, 1, 1) -> raw (B, C1, 4, 4)."""
    B, nz = z.shape[0], z.shape[1]
    C1 = w1.shape[1]
    z2 = z.reshape(B, nz)
    w1f = w1.reshape(nz, C1 * 16)
    out = pl.pallas_call(
        _fc_kernel,
        out_shape=jax.ShapeDtypeStruct((B, C1 * 16), z.dtype),
        grid_spec=pltpu.PrefetchScalarGridSpec(
            num_scalar_prefetch=0,
            grid=(1,),
            in_specs=[pl.BlockSpec((B, nz), lambda i: (0, 0)),
                      pl.BlockSpec((nz, C1 * 16), lambda i: (0, 0))],
            out_specs=pl.BlockSpec((B, C1 * 16), lambda i: (0, 0)),
        ),
        compiler_params=pltpu.CompilerParams(dimension_semantics=("arbitrary",)),
    )(z2, w1f)
    return out.reshape(B, C1, 4, 4)


def _upsample_conv_layer(x_raw, scale, shift, wt, out_act):
    """BN(scale,shift)+ReLU on x_raw, then ConvTranspose2d(k=4, s=2, p=1, bias=False).

    Returns the RAW conv output (B, Cout, 2H, 2W) (optionally tanh'ed for the last layer).
    """
    B, Cin, H, W = x_raw.shape
    Cout = wt.shape[1]
    Hp, Wp = H + 2, W + 2
    HWp = H * Wp
    L = Hp * Wp + 2

    # Spatially pad the raw input by 1, flatten, add a 1-element flat margin so
    # every tap is a contiguous lane slice inside the kernel.  (Tiny tensors;
    # these XLA ops fuse with the previous layer's phase interleave.)
    xp = jnp.pad(x_raw, ((0, 0), (0, 0), (1, 1), (1, 1)))
    xf = jnp.pad(xp.reshape(B, Cin, Hp * Wp), ((0, 0), (0, 0), (1, 1)))       # (B, Cin, L)

    mask2d = jnp.zeros((Hp, Wp), x_raw.dtype).at[1:H + 1, 1:W + 1].set(1.0)
    mask = jnp.pad(mask2d.reshape(1, Hp * Wp), ((0, 0), (1, 1)))              # (1, L)

    wph = _phase_weights(wt)                                                  # (4, Cout, 4Cin)

    kernel = functools.partial(_upconv_phase_kernel, H=H, W=W, out_act=out_act)
    out_ph = pl.pallas_call(
        kernel,
        out_shape=jax.ShapeDtypeStruct((B, 4, Cout, HWp), x_raw.dtype),
        grid_spec=pltpu.PrefetchScalarGridSpec(
            num_scalar_prefetch=0,
            grid=(B,),
            in_specs=[
                pl.BlockSpec((1, Cin, L), lambda b: (b, 0, 0)),
                pl.BlockSpec((Cin, 1), lambda b: (0, 0)),
                pl.BlockSpec((Cin, 1), lambda b: (0, 0)),
                pl.BlockSpec((1, L), lambda b: (0, 0)),
                pl.BlockSpec((4, Cout, 4 * Cin), lambda b: (0, 0, 0)),
            ],
            out_specs=pl.BlockSpec((1, 4, Cout, HWp), lambda b: (b, 0, 0, 0)),
        ),
        compiler_params=pltpu.CompilerParams(dimension_semantics=("parallel",)),
    )(xf, scale, shift, mask, wph)

    # Drop the junk padded columns and interleave the 4 phases into pixels.
    q = out_ph.reshape(B, 2, 2, Cout, H, Wp)[:, :, :, :, :, 1:W + 1]          # (B,2,2,Cout,H,W)
    out = q.transpose(0, 3, 4, 1, 5, 2).reshape(B, Cout, 2 * H, 2 * W)
    return out


def generator32_forward(z, params):
    """Forward pass of Generator32 (training-mode BatchNorm, bias-free convs)."""
    w1, g1, b1, w2, g2, b2, w3, g3, b3, w4 = params
    h1 = _input_projection(z, w1)                                  # raw conv1 (B, 8ngf, 4, 4)
    s1, t1 = _bn_scale_shift(h1, g1, b1)
    h2 = _upsample_conv_layer(h1, s1, t1, w2, out_act=None)        # raw conv2 (B, 4ngf, 8, 8)
    s2, t2 = _bn_scale_shift(h2, g2, b2)
    h3 = _upsample_conv_layer(h2, s2, t2, w3, out_act=None)        # raw conv3 (B, 2ngf, 16, 16)
    s3, t3 = _bn_scale_shift(h3, g3, b3)
    out = _upsample_conv_layer(h3, s3, t3, w4, out_act="tanh")     # (B, nc, 32, 32)
    return out
    # TODO(synk): eval-mode BatchNorm would only swap the batch stats above for
    # running stats; the Pallas kernels are unchanged.


# ----------------------------------------------------------------------------
# Pure-JAX reference (same math, via lax conv) for the self-check
# ----------------------------------------------------------------------------
def _convT_ref(x, wt, stride, pad):
    k = wt.shape[2]
    wf = jnp.flip(wt, (2, 3)).transpose(1, 0, 2, 3)               # (Cout, Cin, k, k)
    return jax.lax.conv_general_dilated(
        x, wf, window_strides=(1, 1),
        padding=[(k - 1 - pad, k - 1 - pad)] * 2,
        lhs_dilation=(stride, stride),
        dimension_numbers=("NCHW", "OIHW", "NCHW"))


def _bn_relu_ref(x, gamma, beta, eps=1e-5):
    mean = jnp.mean(x, axis=(0, 2, 3), keepdims=True)
    var = jnp.var(x, axis=(0, 2, 3), keepdims=True)
    xn = (x - mean) * jax.lax.rsqrt(var + eps)
    return jax.nn.relu(xn * gamma[None, :, None, None] + beta[None, :, None, None])


def generator32_reference(z, params):
    w1, g1, b1, w2, g2, b2, w3, g3, b3, w4 = params
    h = _convT_ref(z, w1, 1, 0)
    h = _bn_relu_ref(h, g1, b1)
    h = _convT_ref(h, w2, 2, 1)
    h = _bn_relu_ref(h, g2, b2)
    h = _convT_ref(h, w3, 2, 1)
    h = _bn_relu_ref(h, g3, b3)
    h = _convT_ref(h, w4, 2, 1)
    return jnp.tanh(h)


# ----------------------------------------------------------------------------
if __name__ == "__main__":
    key = jax.random.PRNGKey(0)
    ks = jax.random.split(key, 12)

    # Small shapes consistent with the module: z_noise=16, num_gen_filters=8, channels=3.
    B, nz, ngf, nc = 2, 16, 8, 3
    C1, C2, C3 = ngf * 8, ngf * 4, ngf * 2          # 64, 32, 16

    z = jax.random.normal(ks[0], (B, nz, 1, 1), jnp.float32)
    # ConvTranspose2d weights are stored as (in_channels, out_channels, kH, kW).
    w1 = 0.1 * jax.random.normal(ks[1], (nz, C1, 4, 4), jnp.float32)
    w2 = 0.1 * jax.random.normal(ks[2], (C1, C2, 4, 4), jnp.float32)
    w3 = 0.1 * jax.random.normal(ks[3], (C2, C3, 4, 4), jnp.float32)
    w4 = 0.1 * jax.random.normal(ks[4], (C3, nc, 4, 4), jnp.float32)
    g1 = 1.0 + 0.1 * jax.random.normal(ks[5], (C1,), jnp.float32)
    b1 = 0.1 * jax.random.normal(ks[6], (C1,), jnp.float32)
    g2 = 1.0 + 0.1 * jax.random.normal(ks[7], (C2,), jnp.float32)
    b2 = 0.1 * jax.random.normal(ks[8], (C2,), jnp.float32)
    g3 = 1.0 + 0.1 * jax.random.normal(ks[9], (C3,), jnp.float32)
    b3 = 0.1 * jax.random.normal(ks[10], (C3,), jnp.float32)

    params = (w1, g1, b1, w2, g2, b2, w3, g3, b3, w4)

    fwd = jax.jit(generator32_forward)
    out = jax.block_until_ready(fwd(z, params))
    assert out.shape == (B, nc, 32, 32), out.shape

    ref = generator32_reference(z, params)
    err = float(jnp.max(jnp.abs(out - ref)))
    assert jnp.allclose(out, ref, atol=1e-3, rtol=1e-3), f"max abs err {err}"

    print("KERNEL_OK")
</pallas_src>

<mosaic_0001>
module attributes {stable_mosaic.version = 11 : i64} {
  func.func @_fc_kernel(%arg0: i32, %arg1: memref<2x16xf32, #tpu.memory_space<vmem>>, %arg2: memref<16x1024xf32, #tpu.memory_space<vmem>>, %arg3: memref<2x1024xf32, #tpu.memory_space<vmem>>) attributes {dimension_semantics = [#tpu.dimension_semantics<arbitrary>], iteration_bounds = array<i64: 1>, scalar_prefetch = 0 : i64, scratch_operands = 0 : i64, tpu.core_type = #tpu.core_type<tc>, window_params = [{pipeline_mode = #tpu.pipeline_mode<synchronous>, transform_indices = @transform_0, window_bounds = array<i64: 2, 16>}, {pipeline_mode = #tpu.pipeline_mode<synchronous>, transform_indices = @transform_1, window_bounds = array<i64: 16, 1024>}, {pipeline_mode = #tpu.pipeline_mode<synchronous>, transform_indices = @transform_2, window_bounds = array<i64: 2, 1024>}]} {
    %c0 = arith.constant 0 : index
    %c0_0 = arith.constant 0 : index
    %0 = vector.load %arg1[%c0, %c0_0] : memref<2x16xf32, #tpu.memory_space<vmem>>, vector<2x16xf32>
    %c0_1 = arith.constant 0 : index
    %c0_2 = arith.constant 0 : index
    %1 = vector.load %arg2[%c0_1, %c0_2] : memref<16x1024xf32, #tpu.memory_space<vmem>>, vector<16x1024xf32>
    %cst = arith.constant dense<0.000000e+00> : vector<2x1024xf32>
    %2 = tpu.matmul %0, %1, %cst {dimension_numbers = #tpu.dot_dimension_numbers<[1], [0], [0], [1], [0, 0, 1, 1], [], []>} : vector<2x16xf32>, vector<16x1024xf32>, vector<2x1024xf32> -> vector<2x1024xf32>
    %c0_3 = arith.constant 0 : index
    %c0_4 = arith.constant 0 : index
    %3 = vector.load %arg3[%c0_3, %c0_4] : memref<2x1024xf32, #tpu.memory_space<vmem>>, vector<2x1024xf32>
    tpu.vector_store %arg3[%c0_3, %c0_4], %2 {strides = array<i32>} : memref<2x1024xf32, #tpu.memory_space<vmem>>, vector<2x1024xf32>,
    return
  }
  func.func @transform_0(%arg0: i32) -> (i32, i32) {
    %c0_i32 = arith.constant 0 : i32
    %c0_i32_0 = arith.constant 0 : i32
    %c0_i32_1 = arith.constant 0 : i32
    return %c0_i32, %c0_i32_0 : i32, i32
  }
  func.func @transform_1(%arg0: i32) -> (i32, i32) {
    %c0_i32 = arith.constant 0 : i32
    %c0_i32_0 = arith.constant 0 : i32
    %c0_i32_1 = arith.constant 0 : i32
    return %c0_i32, %c0_i32_0 : i32, i32
  }
  func.func @transform_2(%arg0: i32) -> (i32, i32) {
    %c0_i32 = arith.constant 0 : i32
    %c0_i32_0 = arith.constant 0 : i32
    %c0_i32_1 = arith.constant 0 : i32
    return %c0_i32, %c0_i32_0 : i32, i32
  }
}

module attributes {stable_mosaic.version = 11 : i64} {
  func.func @_upconv_phase_kernel(%arg0: i32, %arg1: memref<1x64x38xf32, #tpu.memory_space<vmem>>, %arg2: memref<64x1xf32, #tpu.memory_space<vmem>>, %arg3: memref<64x1xf32, #tpu.memory_space<vmem>>, %arg4: memref<1x38xf32, #tpu.memory_space<vmem>>, %arg5: memref<4x32x256xf32, #tpu.memory_space<vmem>>, %arg6: memref<1x4x32x24xf32, #tpu.memory_space<vmem>>) attributes {dimension_semantics = [#tpu.dimension_semantics<parallel>], iteration_bounds = array<i64: 2>, scalar_prefetch = 0 : i64, scratch_operands = 0 : i64, tpu.core_type = #tpu.core_type<tc>, window_params = [{transform_indices = @transform_0, window_bounds = array<i64: 1, 64, 38>}, {pipeline_mode = #tpu.pipeline_mode<synchronous>, transform_indices = @transform_1, window_bounds = array<i64: 64, 1>}, {pipeline_mode = #tpu.pipeline_mode<synchronous>, transform_indices = @transform_2, window_bounds = array<i64: 64, 1>}, {pipeline_mode = #tpu.pipeline_mode<synchronous>, transform_indices = @transform_3, window_bounds = array<i64: 1, 38>}, {pipeline_mode = #tpu.pipeline_mode<synchronous>, transform_indices = @transform_4, window_bounds = array<i64: 4, 32, 256>}, {transform_indices = @transform_5, window_bounds = array<i64: 1, 4, 32, 24>}]} {
    %c0 = arith.constant 0 : index
    %c0_0 = arith.constant 0 : index
    %c0_1 = arith.constant 0 : index
    %0 = vector.load %arg1[%c0, %c0_0, %c0_1] : memref<1x64x38xf32, #tpu.memory_space<vmem>>, vector<1x64x38xf32>
    %1 = vector.shape_cast %0 : vector<1x64x38xf32> to vector<64x38xf32>
    %c0_2 = arith.constant 0 : index
    %c0_3 = arith.constant 0 : index
    %2 = vector.load %arg2[%c0_2, %c0_3] : memref<64x1xf32, #tpu.memory_space<vmem>>, vector<64x1xf32>
    %3 = vector.broadcast %2 : vector<64x1xf32> to vector<64x38xf32>
    %4 = arith.mulf %1, %3 : vector<64x38xf32>
    %c0_4 = arith.constant 0 : index
    %c0_5 = arith.constant 0 : index
    %5 = vector.load %arg3[%c0_4, %c0_5] : memref<64x1xf32, #tpu.memory_space<vmem>>, vector<64x1xf32>
    %6 = vector.broadcast %5 : vector<64x1xf32> to vector<64x38xf32>
    %7 = arith.addf %4, %6 : vector<64x38xf32>
    %cst = arith.constant 0.000000e+00 : f32
    %8 = vector.broadcast %cst : f32 to vector<64x38xf32>
    %9 = arith.maximumf %7, %8 : vector<64x38xf32>
    %c0_6 = arith.constant 0 : index
    %c0_7 = arith.constant 0 : index
    %10 = vector.load %arg4[%c0_6, %c0_7] : memref<1x38xf32, #tpu.memory_space<vmem>>, vector<1x38xf32>
    %11 = vector.broadcast %10 : vector<1x38xf32> to vector<64x38xf32>
    %12 = arith.mulf %9, %11 : vector<64x38xf32>
    %13 = vector.extract_strided_slice %12 {offsets = [0, 0], sizes = [64, 24], strides = [1, 1]} : vector<64x38xf32> to vector<64x24xf32>
    %14 = vector.extract_strided_slice %12 {offsets = [0, 1], sizes = [64, 24], strides = [1, 1]} : vector<64x38xf32> to vector<64x24xf32>
    %15 = vector.extract_strided_slice %12 {offsets = [0, 2], sizes = [64, 24], strides = [1, 1]} : vector<64x38xf32> to vector<64x24xf32>
    %16 = vector.extract_strided_slice %12 {offsets = [0, 6], sizes = [64, 24], strides = [1, 1]} : vector<64x38xf32> to vector<64x24xf32>
    %17 = vector.extract_strided_slice %12 {offsets = [0, 7], sizes = [64, 24], strides = [1, 1]} : vector<64x38xf32> to vector<64x24xf32>
    %18 = vector.extract_strided_slice %12 {offsets = [0, 8], sizes = [64, 24], strides = [1, 1]} : vector<64x38xf32> to vector<64x24xf32>
    %19 = vector.extract_strided_slice %12 {offsets = [0, 12], sizes = [64, 24], strides = [1, 1]} : vector<64x38xf32> to vector<64x24xf32>
    %20 = vector.extract_strided_slice %12 {offsets = [0, 13], sizes = [64, 24], strides = [1, 1]} : vector<64x38xf32> to vector<64x24xf32>
    %21 = vector.extract_strided_slice %12 {offsets = [0, 14], sizes = [64, 24], strides = [1, 1]} : vector<64x38xf32> to vector<64x24xf32>
    %22 = tpu.concatenate %13, %14, %16, %17 in 0 : vector<64x24xf32>, vector<64x24xf32>, vector<64x24xf32>, vector<64x24xf32> -> vector<256x24xf32>
    %c0_8 = arith.constant 0 : index
    %c0_9 = arith.constant 0 : index
    %c0_10 = arith.constant 0 : index
    %23 = vector.load %arg5[%c0_8, %c0_9, %c0_10] : memref<4x32x256xf32, #tpu.memory_space<vmem>>, vector<1x32x256xf32>
    %24 = vector.shape_cast %23 : vector<1x32x256xf32> to vector<32x256xf32>
    %cst_11 = arith.constant dense<0.000000e+00> : vector<32x24xf32>
    %25 = tpu.matmul %24, %22, %cst_11 {dimension_numbers = #tpu.dot_dimension_numbers<[1], [0], [0], [1], [0, 0, 1, 1], [], []>} : vector<32x256xf32>, vector<256x24xf32>, vector<32x24xf32> -> vector<32x24xf32>
    %c0_12 = arith.constant 0 : index
    %c0_13 = arith.constant 0 : index
    %c0_14 = arith.constant 0 : index
    %c0_15 = arith.constant 0 : index
    %26 = vector.load %arg6[%c0_12, %c0_13, %c0_14, %c0_15] : memref<1x4x32x24xf32, #tpu.memory_space<vmem>>, vector<1x1x32x24xf32>
    %27 = vector.shape_cast %26 : vector<1x1x32x24xf32> to vector<32x24xf32>
    %28 = vector.shape_cast %25 : vector<32x24xf32> to vector<1x1x32x24xf32>
    tpu.vector_store %arg6[%c0_12, %c0_13, %c0_14, %c0_15], %28 {strides = array<i32>} : memref<1x4x32x24xf32, #tpu.memory_space<vmem>>, vector<1x1x32x24xf32>,
    %29 = tpu.concatenate %14, %15, %17, %18 in 0 : vector<64x24xf32>, vector<64x24xf32>, vector<64x24xf32>, vector<64x24xf32> -> vector<256x24xf32>
    %c1 = arith.constant 1 : index
    %c0_16 = arith.constant 0 : index
    %c0_17 = arith.constant 0 : index
    %30 = vector.load %arg5[%c1, %c0_16, %c0_17] : memref<4x32x256xf32, #tpu.memory_space<vmem>>, vector<1x32x256xf32>
    %31 = vector.shape_cast %30 : vector<1x32x256xf32> to vector<32x256xf32>
    %cst_18 = arith.constant dense<0.000000e+00> : vector<32x24xf32>
    %32 = tpu.matmul %31, %29, %cst_18 {dimension_numbers = #tpu.dot_dimension_numbers<[1], [0], [0], [1], [0, 0, 1, 1], [], []>} : vector<32x256xf32>, vector<256x24xf32>, vector<32x24xf32> -> vector<32x24xf32>
    %c0_19 = arith.constant 0 : index
    %c1_20 = arith.constant 1 : index
    %c0_21 = arith.constant 0 : index
    %c0_22 = arith.constant 0 : index
    %33 = vector.load %arg6[%c0_19, %c1_20, %c0_21, %c0_22] : memref<1x4x32x24xf32, #tpu.memory_space<vmem>>, vector<1x1x32x24xf32>
    %34 = vector.shape_cast %33 : vector<1x1x32x24xf32> to vector<32x24xf32>
    %35 = vector.shape_cast %32 : vector<32x24xf32> to vector<1x1x32x24xf32>
    tpu.vector_store %arg6[%c0_19, %c1_20, %c0_21, %c0_22], %35 {strides = array<i32>} : memref<1x4x32x24xf32, #tpu.memory_space<vmem>>, vector<1x1x32x24xf32>,
    %36 = tpu.concatenate %16, %17, %19, %20 in 0 : vector<64x24xf32>, vector<64x24xf32>, vector<64x24xf32>, vector<64x24xf32> -> vector<256x24xf32>
    %c2 = arith.constant 2 : index
    %c0_23 = arith.constant 0 : index
    %c0_24 = arith.constant 0 : index
    %37 = vector.load %arg5[%c2, %c0_23, %c0_24] : memref<4x32x256xf32, #tpu.memory_space<vmem>>, vector<1x32x256xf32>
    %38 = vector.shape_cast %37 : vector<1x32x256xf32> to vector<32x256xf32>
    %cst_25 = arith.constant dense<0.000000e+00> : vector<32x24xf32>
    %39 = tpu.matmul %38, %36, %cst_25 {dimension_numbers = #tpu.dot_dimension_numbers<[1], [0], [0], [1], [0, 0, 1, 1], [], []>} : vector<32x256xf32>, vector<256x24xf32>, vector<32x24xf32> -> vector<32x24xf32>
    %c0_26 = arith.constant 0 : index
    %c2_27 = arith.constant 2 : index
    %c0_28 = arith.constant 0 : index
    %c0_29 = arith.constant 0 : index
    %40 = vector.load %arg6[%c0_26, %c2_27, %c0_28, %c0_29] : memref<1x4x32x24xf32, #tpu.memory_space<vmem>>, vector<1x1x32x24xf32>
    %41 = vector.shape_cast %40 : vector<1x1x32x24xf32> to vector<32x24xf32>
    %42 = vector.shape_cast %39 : vector<32x24xf32> to vector<1x1x32x24xf32>
    tpu.vector_store %arg6[%c0_26, %c2_27, %c0_28, %c0_29], %42 {strides = array<i32>} : memref<1x4x32x24xf32, #tpu.memory_space<vmem>>, vector<1x1x32x24xf32>,
    %43 = tpu.concatenate %17, %18, %20, %21 in 0 : vector<64x24xf32>, vector<64x24xf32>, vector<64x24xf32>, vector<64x24xf32> -> vector<256x24xf32>
    %c3 = arith.constant 3 : index
    %c0_30 = arith.constant 0 : index
    %c0_31 = arith.constant 0 : index
    %44 = vector.load %arg5[%c3, %c0_30, %c0_31] : memref<4x32x256xf32, #tpu.memory_space<vmem>>, vector<1x32x256xf32>
    %45 = vector.shape_cast %44 : vector<1x32x256xf32> to vector<32x256xf32>
    %cst_32 = arith.constant dense<0.000000e+00> : vector<32x24xf32>
    %46 = tpu.matmul %45, %43, %cst_32 {dimension_numbers = #tpu.dot_dimension_numbers<[1], [0], [0], [1], [0, 0, 1, 1], [], []>} : vector<32x256xf32>, vector<256x24xf32>, vector<32x24xf32> -> vector<32x24xf32>
    %c0_33 = arith.constant 0 : index
    %c3_34 = arith.constant 3 : index
    %c0_35 = arith.constant 0 : index
    %c0_36 = arith.constant 0 : index
    %47 = vector.load %arg6[%c0_33, %c3_34, %c0_35, %c0_36] : memref<1x4x32x24xf32, #tpu.memory_space<vmem>>, vector<1x1x32x24xf32>
    %48 = vector.shape_cast %47 : vector<1x1x32x24xf32> to vector<32x24xf32>
    %49 = vector.shape_cast %46 : vector<32x24xf32> to vector<1x1x32x24xf32>
    tpu.vector_store %arg6[%c0_33, %c3_34, %c0_35, %c0_36], %49 {strides = array<i32>} : memref<1x4x32x24xf32, #tpu.memory_space<vmem>>, vector<1x1x32x24xf32>,
    return
  }
  func.func @transform_0(%arg0: i32) -> (i32, i32, i32) {
    %c0_i32 = arith.constant 0 : i32
    %c0_i32_0 = arith.constant 0 : i32
    %c0_i32_1 = arith.constant 0 : i32
    return %arg0, %c0_i32, %c0_i32_0 : i32, i32, i32
  }
  func.func @transform_1(%arg0: i32) -> (i32, i32) {
    %c0_i32 = arith.constant 0 : i32
    %c0_i32_0 = arith.constant 0 : i32
    %c0_i32_1 = arith.constant 0 : i32
    return %c0_i32, %c0_i32_0 : i32, i32
  }
  func.func @transform_2(%arg0: i32) -> (i32, i32) {
    %c0_i32 = arith.constant 0 : i32
    %c0_i32_0 = arith.constant 0 : i32
    %c0_i32_1 = arith.constant 0 : i32
    return %c0_i32, %c0_i32_0 : i32, i32
  }
  func.func @transform_3(%arg0: i32) -> (i32, i32) {
    %c0_i32 = arith.constant 0 : i32
    %c0_i32_0 = arith.constant 0 : i32
    %c0_i32_1 = arith.constant 0 : i32
    return %c0_i32, %c0_i32_0 : i32, i32
  }
  func.func @transform_4(%arg0: i32) -> (i32, i32, i32) {
    %c0_i32 = arith.constant 0 : i32
    %c0_i32_0 = arith.constant 0 : i32
    %c0_i32_1 = arith.constant 0 : i32
    %c0_i32_2 = arith.constant 0 : i32
    return %c0_i32, %c0_i32_0, %c0_i32_1 : i32, i32, i32
  }
  func.func @transform_5(%arg0: i32) -> (i32, i32, i32, i32) {
    %c0_i32 = arith.constant 0 : i32
    %c0_i32_0 = arith.constant 0 : i32
    %c0_i32_1 = arith.constant 0 : i32
    %c0_i32_2 = arith.constant 0 : i32
    return %arg0, %c0_i32, %c0_i32_0, %c0_i32_1 : i32, i32, i32, i32
  }
}

module attributes {stable_mosaic.version = 11 : i64} {
  func.func @_upconv_phase_kernel(%arg0: i32, %arg1: memref<1x32x102xf32, #tpu.memory_space<vmem>>, %arg2: memref<32x1xf32, #tpu.memory_space<vmem>>, %arg3: memref<32x1xf32, #tpu.memory_space<vmem>>, %arg4: memref<1x102xf32, #tpu.memory_space<vmem>>, %arg5: memref<4x16x128xf32, #tpu.memory_space<vmem>>, %arg6: memref<1x4x16x80xf32, #tpu.memory_space<vmem>>) attributes {dimension_semantics = [#tpu.dimension_semantics<parallel>], iteration_bounds = array<i64: 2>, scalar_prefetch = 0 : i64, scratch_operands = 0 : i64, tpu.core_type = #tpu.core_type<tc>, window_params = [{transform_indices = @transform_0, window_bounds = array<i64: 1, 32, 102>}, {pipeline_mode = #tpu.pipeline_mode<synchronous>, transform_indices = @transform_1, window_bounds = array<i64: 32, 1>}, {pipeline_mode = #tpu.pipeline_mode<synchronous>, transform_indices = @transform_2, window_bounds = array<i64: 32, 1>}, {pipeline_mode = #tpu.pipeline_mode<synchronous>, transform_indices = @transform_3, window_bounds = array<i64: 1, 102>}, {pipeline_mode = #tpu.pipeline_mode<synchronous>, transform_indices = @transform_4, window_bounds = array<i64: 4, 16, 128>}, {transform_indices = @transform_5, window_bounds = array<i64: 1, 4, 16, 80>}]} {
    %c0 = arith.constant 0 : index
    %c0_0 = arith.constant 0 : index
    %c0_1 = arith.constant 0 : index
    %0 = vector.load %arg1[%c0, %c0_0, %c0_1] : memref<1x32x102xf32, #tpu.memory_space<vmem>>, vector<1x32x102xf32>
    %1 = vector.shape_cast %0 : vector<1x32x102xf32> to vector<32x102xf32>
    %c0_2 = arith.constant 0 : index
    %c0_3 = arith.constant 0 : index
    %2 = vector.load %arg2[%c0_2, %c0_3] : memref<32x1xf32, #tpu.memory_space<vmem>>, vector<32x1xf32>
    %3 = vector.broadcast %2 : vector<32x1xf32> to vector<32x102xf32>
    %4 = arith.mulf %1, %3 : vector<32x102xf32>
    %c0_4 = arith.constant 0 : index
    %c0_5 = arith.constant 0 : index
    %5 = vector.load %arg3[%c0_4, %c0_5] : memref<32x1xf32, #tpu.memory_space<vmem>>, vector<32x1xf32>
    %6 = vector.broadcast %5 : vector<32x1xf32> to vector<32x102xf32>
    %7 = arith.addf %4, %6 : vector<32x102xf32>
    %cst = arith.constant 0.000000e+00 : f32
    %8 = vector.broadcast %cst : f32 to vector<32x102xf32>
    %9 = arith.maximumf %7, %8 : vector<32x102xf32>
    %c0_6 = arith.constant 0 : index
    %c0_7 = arith.constant 0 : index
    %10 = vector.load %arg4[%c0_6, %c0_7] : memref<1x102xf32, #tpu.memory_space<vmem>>, vector<1x102xf32>
    %11 = vector.broadcast %10 : vector<1x102xf32> to vector<32x102xf32>
    %12 = arith.mulf %9, %11 : vector<32x102xf32>
    %13 = vector.extract_strided_slice %12 {offsets = [0, 0], sizes = [32, 80], strides = [1, 1]} : vector<32x102xf32> to vector<32x80xf32>
    %14 = vector.extract_strided_slice %12 {offsets = [0, 1], sizes = [32, 80], strides = [1, 1]} : vector<32x102xf32> to vector<32x80xf32>
    %15 = vector.extract_strided_slice %12 {offsets = [0, 2], sizes = [32, 80], strides = [1, 1]} : vector<32x102xf32> to vector<32x80xf32>
    %16 = vector.extract_strided_slice %12 {offsets = [0, 10], sizes = [32, 80], strides = [1, 1]} : vector<32x102xf32> to vector<32x80xf32>
    %17 = vector.extract_strided_slice %12 {offsets = [0, 11], sizes = [32, 80], strides = [1, 1]} : vector<32x102xf32> to vector<32x80xf32>
    %18 = vector.extract_strided_slice %12 {offsets = [0, 12], sizes = [32, 80], strides = [1, 1]} : vector<32x102xf32> to vector<32x80xf32>
    %19 = vector.extract_strided_slice %12 {offsets = [0, 20], sizes = [32, 80], strides = [1, 1]} : vector<32x102xf32> to vector<32x80xf32>
    %20 = vector.extract_strided_slice %12 {offsets = [0, 21], sizes = [32, 80], strides = [1, 1]} : vector<32x102xf32> to vector<32x80xf32>
    %21 = vector.extract_strided_slice %12 {offsets = [0, 22], sizes = [32, 80], strides = [1, 1]} : vector<32x102xf32> to vector<32x80xf32>
    %22 = tpu.concatenate %13, %14, %16, %17 in 0 : vector<32x80xf32>, vector<32x80xf32>, vector<32x80xf32>, vector<32x80xf32> -> vector<128x80xf32>
    %c0_8 = arith.constant 0 : index
    %c0_9 = arith.constant 0 : index
    %c0_10 = arith.constant 0 : index
    %23 = vector.load %arg5[%c0_8, %c0_9, %c0_10] : memref<4x16x128xf32, #tpu.memory_space<vmem>>, vector<1x16x128xf32>
    %24 = vector.shape_cast %23 : vector<1x16x128xf32> to vector<16x128xf32>
    %cst_11 = arith.constant dense<0.000000e+00> : vector<16x80xf32>
    %25 = tpu.matmul %24, %22, %cst_11 {dimension_numbers = #tpu.dot_dimension_numbers<[1], [0], [0], [1], [0, 0, 1, 1], [], []>} : vector<16x128xf32>, vector<128x80xf32>, vector<16x80xf32> -> vector<16x80xf32>
    %c0_12 = arith.constant 0 : index
    %c0_13 = arith.constant 0 : index
    %c0_14 = arith.constant 0 : index
    %c0_15 = arith.constant 0 : index
    %26 = vector.load %arg6[%c0_12, %c0_13, %c0_14, %c0_15] : memref<1x4x16x80xf32, #tpu.memory_space<vmem>>, vector<1x1x16x80xf32>
    %27 = vector.shape_cast %26 : vector<1x1x16x80xf32> to vector<16x80xf32>
    %28 = vector.shape_cast %25 : vector<16x80xf32> to vector<1x1x16x80xf32>
    tpu.vector_store %arg6[%c0_12, %c0_13, %c0_14, %c0_15], %28 {strides = array<i32>} : memref<1x4x16x80xf32, #tpu.memory_space<vmem>>, vector<1x1x16x80xf32>,
    %29 = tpu.concatenate %14, %15, %17, %18 in 0 : vector<32x80xf32>, vector<32x80xf32>, vector<32x80xf32>, vector<32x80xf32> -> vector<128x80xf32>
    %c1 = arith.constant 1 : index
    %c0_16 = arith.constant 0 : index
    %c0_17 = arith.constant 0 : index
    %30 = vector.load %arg5[%c1, %c0_16, %c0_17] : memref<4x16x128xf32, #tpu.memory_space<vmem>>, vector<1x16x128xf32>
    %31 = vector.shape_cast %30 : vector<1x16x128xf32> to vector<16x128xf32>
    %cst_18 = arith.constant dense<0.000000e+00> : vector<16x80xf32>
    %32 = tpu.matmul %31, %29, %cst_18 {dimension_numbers = #tpu.dot_dimension_numbers<[1], [0], [0], [1], [0, 0, 1, 1], [], []>} : vector<16x128xf32>, vector<128x80xf32>, vector<16x80xf32> -> vector<16x80xf32>
    %c0_19 = arith.constant 0 : index
    %c1_20 = arith.constant 1 : index
    %c0_21 = arith.constant 0 : index
    %c0_22 = arith.constant 0 : index
    %33 = vector.load %arg6[%c0_19, %c1_20, %c0_21, %c0_22] : memref<1x4x16x80xf32, #tpu.memory_space<vmem>>, vector<1x1x16x80xf32>
    %34 = vector.shape_cast %33 : vector<1x1x16x80xf32> to vector<16x80xf32>
    %35 = vector.shape_cast %32 : vector<16x80xf32> to vector<1x1x16x80xf32>
    tpu.vector_store %arg6[%c0_19, %c1_20, %c0_21, %c0_22], %35 {strides = array<i32>} : memref<1x4x16x80xf32, #tpu.memory_space<vmem>>, vector<1x1x16x80xf32>,
    %36 = tpu.concatenate %16, %17, %19, %20 in 0 : vector<32x80xf32>, vector<32x80xf32>, vector<32x80xf32>, vector<32x80xf32> -> vector<128x80xf32>
    %c2 = arith.constant 2 : index
    %c0_23 = arith.constant 0 : index
    %c0_24 = arith.constant 0 : index
    %37 = vector.load %arg5[%c2, %c0_23, %c0_24] : memref<4x16x128xf32, #tpu.memory_space<vmem>>, vector<1x16x128xf32>
    %38 = vector.shape_cast %37 : vector<1x16x128xf32> to vector<16x128xf32>
    %cst_25 = arith.constant dense<0.000000e+00> : vector<16x80xf32>
    %39 = tpu.matmul %38, %36, %cst_25 {dimension_numbers = #tpu.dot_dimension_numbers<[1], [0], [0], [1], [0, 0, 1, 1], [], []>} : vector<16x128xf32>, vector<128x80xf32>, vector<16x80xf32> -> vector<16x80xf32>
    %c0_26 = arith.constant 0 : index
    %c2_27 = arith.constant 2 : index
    %c0_28 = arith.constant 0 : index
    %c0_29 = arith.constant 0 : index
    %40 = vector.load %arg6[%c0_26, %c2_27, %c0_28, %c0_29] : memref<1x4x16x80xf32, #tpu.memory_space<vmem>>, vector<1x1x16x80xf32>
    %41 = vector.shape_cast %40 : vector<1x1x16x80xf32> to vector<16x80xf32>
    %42 = vector.shape_cast %39 : vector<16x80xf32> to vector<1x1x16x80xf32>
    tpu.vector_store %arg6[%c0_26, %c2_27, %c0_28, %c0_29], %42 {strides = array<i32>} : memref<1x4x16x80xf32, #tpu.memory_space<vmem>>, vector<1x1x16x80xf32>,
    %43 = tpu.concatenate %17, %18, %20, %21 in 0 : vector<32x80xf32>, vector<32x80xf32>, vector<32x80xf32>, vector<32x80xf32> -> vector<128x80xf32>
    %c3 = arith.constant 3 : index
    %c0_30 = arith.constant 0 : index
    %c0_31 = arith.constant 0 : index
    %44 = vector.load %arg5[%c3, %c0_30, %c0_31] : memref<4x16x128xf32, #tpu.memory_space<vmem>>, vector<1x16x128xf32>
    %45 = vector.shape_cast %44 : vector<1x16x128xf32> to vector<16x128xf32>
    %cst_32 = arith.constant dense<0.000000e+00> : vector<16x80xf32>
    %46 = tpu.matmul %45, %43, %cst_32 {dimension_numbers = #tpu.dot_dimension_numbers<[1], [0], [0], [1], [0, 0, 1, 1], [], []>} : vector<16x128xf32>, vector<128x80xf32>, vector<16x80xf32> -> vector<16x80xf32>
    %c0_33 = arith.constant 0 : index
    %c3_34 = arith.constant 3 : index
    %c0_35 = arith.constant 0 : index
    %c0_36 = arith.constant 0 : index
    %47 = vector.load %arg6[%c0_33, %c3_34, %c0_35, %c0_36] : memref<1x4x16x80xf32, #tpu.memory_space<vmem>>, vector<1x1x16x80xf32>
    %48 = vector.shape_cast %47 : vector<1x1x16x80xf32> to vector<16x80xf32>
    %49 = vector.shape_cast %46 : vector<16x80xf32> to vector<1x1x16x80xf32>
    tpu.vector_store %arg6[%c0_33, %c3_34, %c0_35, %c0_36], %49 {strides = array<i32>} : memref<1x4x16x80xf32, #tpu.memory_space<vmem>>, vector<1x1x16x80xf32>,
    return
  }
  func.func @transform_0(%arg0: i32) -> (i32, i32, i32) {
    %c0_i32 = arith.constant 0 : i32
    %c0_i32_0 = arith.constant 0 : i32
    %c0_i32_1 = arith.constant 0 : i32
    return %arg0, %c0_i32, %c0_i32_0 : i32, i32, i32
  }
  func.func @transform_1(%arg0: i32) -> (i32, i32) {
    %c0_i32 = arith.constant 0 : i32
    %c0_i32_0 = arith.constant 0 : i32
    %c0_i32_1 = arith.constant 0 : i32
    return %c0_i32, %c0_i32_0 : i32, i32
  }
  func.func @transform_2(%arg0: i32) -> (i32, i32) {
    %c0_i32 = arith.constant 0 : i32
    %c0_i32_0 = arith.constant 0 : i32
    %c0_i32_1 = arith.constant 0 : i32
    return %c0_i32, %c0_i32_0 : i32, i32
  }
  func.func @transform_3(%arg0: i32) -> (i32, i32) {
    %c0_i32 = arith.constant 0 : i32
    %c0_i32_0 = arith.constant 0 : i32
    %c0_i32_1 = arith.constant 0 : i32
    return %c0_i32, %c0_i32_0 : i32, i32
  }
  func.func @transform_4(%arg0: i32) -> (i32, i32, i32) {
    %c0_i32 = arith.constant 0 : i32
    %c0_i32_0 = arith.constant 0 : i32
    %c0_i32_1 = arith.constant 0 : i32
    %c0_i32_2 = arith.constant 0 : i32
    return %c0_i32, %c0_i32_0, %c0_i32_1 : i32, i32, i32
  }
  func.func @transform_5(%arg0: i32) -> (i32, i32, i32, i32) {
    %c0_i32 = arith.constant 0 : i32
    %c0_i32_0 = arith.constant 0 : i32
    %c0_i32_1 = arith.constant 0 : i32
    %c0_i32_2 = arith.constant 0 : i32
    return %arg0, %c0_i32, %c0_i32_0, %c0_i32_1 : i32, i32, i32, i32
  }
}

module attributes {stable_mosaic.version = 11 : i64} {
  func.func @_upconv_phase_kernel(%arg0: i32, %arg1: memref<1x16x326xf32, #tpu.memory_space<vmem>>, %arg2: memref<16x1xf32, #tpu.memory_space<vmem>>, %arg3: memref<16x1xf32, #tpu.memory_space<vmem>>, %arg4: memref<1x326xf32, #tpu.memory_space<vmem>>, %arg5: memref<4x3x64xf32, #tpu.memory_space<vmem>>, %arg6: memref<1x4x3x288xf32, #tpu.memory_space<vmem>>) attributes {dimension_semantics = [#tpu.dimension_semantics<parallel>], iteration_bounds = array<i64: 2>, scalar_prefetch = 0 : i64, scratch_operands = 0 : i64, tpu.core_type = #tpu.core_type<tc>, window_params = [{transform_indices = @transform_0, window_bounds = array<i64: 1, 16, 326>}, {pipeline_mode = #tpu.pipeline_mode<synchronous>, transform_indices = @transform_1, window_bounds = array<i64: 16, 1>}, {pipeline_mode = #tpu.pipeline_mode<synchronous>, transform_indices = @transform_2, window_bounds = array<i64: 16, 1>}, {pipeline_mode = #tpu.pipeline_mode<synchronous>, transform_indices = @transform_3, window_bounds = array<i64: 1, 326>}, {pipeline_mode = #tpu.pipeline_mode<synchronous>, transform_indices = @transform_4, window_bounds = array<i64: 4, 3, 64>}, {transform_indices = @transform_5, window_bounds = array<i64: 1, 4, 3, 288>}]} {
    %c0 = arith.constant 0 : index
    %c0_0 = arith.constant 0 : index
    %c0_1 = arith.constant 0 : index
    %0 = vector.load %arg1[%c0, %c0_0, %c0_1] : memref<1x16x326xf32, #tpu.memory_space<vmem>>, vector<1x16x326xf32>
    %1 = vector.shape_cast %0 : vector<1x16x326xf32> to vector<16x326xf32>
    %c0_2 = arith.constant 0 : index
    %c0_3 = arith.constant 0 : index
    %2 = vector.load %arg2[%c0_2, %c0_3] : memref<16x1xf32, #tpu.memory_space<vmem>>, vector<16x1xf32>
    %3 = vector.broadcast %2 : vector<16x1xf32> to vector<16x326xf32>
    %4 = arith.mulf %1, %3 : vector<16x326xf32>
    %c0_4 = arith.constant 0 : index
    %c0_5 = arith.constant 0 : index
    %5 = vector.load %arg3[%c0_4, %c0_5] : memref<16x1xf32, #tpu.memory_space<vmem>>, vector<16x1xf32>
    %6 = vector.broadcast %5 : vector<16x1xf32> to vector<16x326xf32>
    %7 = arith.addf %4, %6 : vector<16x326xf32>
    %cst = arith.constant 0.000000e+00 : f32
    %8 = vector.broadcast %cst : f32 to vector<16x326xf32>
    %9 = arith.maximumf %7, %8 : vector<16x326xf32>
    %c0_6 = arith.constant 0 : index
    %c0_7 = arith.constant 0 : index
    %10 = vector.load %arg4[%c0_6, %c0_7] : memref<1x326xf32, #tpu.memory_space<vmem>>, vector<1x326xf32>
    %11 = vector.broadcast %10 : vector<1x326xf32> to vector<16x326xf32>
    %12 = arith.mulf %9, %11 : vector<16x326xf32>
    %13 = vector.extract_strided_slice %12 {offsets = [0, 0], sizes = [16, 288], strides = [1, 1]} : vector<16x326xf32> to vector<16x288xf32>
    %14 = vector.extract_strided_slice %12 {offsets = [0, 1], sizes = [16, 288], strides = [1, 1]} : vector<16x326xf32> to vector<16x288xf32>
    %15 = vector.extract_strided_slice %12 {offsets = [0, 2], sizes = [16, 288], strides = [1, 1]} : vector<16x326xf32> to vector<16x288xf32>
    %16 = vector.extract_strided_slice %12 {offsets = [0, 18], sizes = [16, 288], strides = [1, 1]} : vector<16x326xf32> to vector<16x288xf32>
    %17 = vector.extract_strided_slice %12 {offsets = [0, 19], sizes = [16, 288], strides = [1, 1]} : vector<16x326xf32> to vector<16x288xf32>
    %18 = vector.extract_strided_slice %12 {offsets = [0, 20], sizes = [16, 288], strides = [1, 1]} : vector<16x326xf32> to vector<16x288xf32>
    %19 = vector.extract_strided_slice %12 {offsets = [0, 36], sizes = [16, 288], strides = [1, 1]} : vector<16x326xf32> to vector<16x288xf32>
    %20 = vector.extract_strided_slice %12 {offsets = [0, 37], sizes = [16, 288], strides = [1, 1]} : vector<16x326xf32> to vector<16x288xf32>
    %21 = vector.extract_strided_slice %12 {offsets = [0, 38], sizes = [16, 288], strides = [1, 1]} : vector<16x326xf32> to vector<16x288xf32>
    %22 = tpu.concatenate %13, %14, %16, %17 in 0 : vector<16x288xf32>, vector<16x288xf32>, vector<16x288xf32>, vector<16x288xf32> -> vector<64x288xf32>
    %c0_8 = arith.constant 0 : index
    %c0_9 = arith.constant 0 : index
    %c0_10 = arith.constant 0 : index
    %23 = vector.load %arg5[%c0_8, %c0_9, %c0_10] : memref<4x3x64xf32, #tpu.memory_space<vmem>>, vector<1x3x64xf32>
    %24 = vector.shape_cast %23 : vector<1x3x64xf32> to vector<3x64xf32>
    %cst_11 = arith.constant dense<0.000000e+00> : vector<3x288xf32>
    %25 = tpu.matmul %24, %22, %cst_11 {dimension_numbers = #tpu.dot_dimension_numbers<[1], [0], [0], [1], [0, 0, 1, 1], [], []>} : vector<3x64xf32>, vector<64x288xf32>, vector<3x288xf32> -> vector<3x288xf32>
    %26 = math.tanh %25 : vector<3x288xf32>
    %c0_12 = arith.constant 0 : index
    %c0_13 = arith.constant 0 : index
    %c0_14 = arith.constant 0 : index
    %c0_15 = arith.constant 0 : index
    %27 = vector.load %arg6[%c0_12, %c0_13, %c0_14, %c0_15] : memref<1x4x3x288xf32, #tpu.memory_space<vmem>>, vector<1x1x3x288xf32>
    %28 = vector.shape_cast %27 : vector<1x1x3x288xf32> to vector<3x288xf32>
    %29 = vector.shape_cast %26 : vector<3x288xf32> to vector<1x1x3x288xf32>
    tpu.vector_store %arg6[%c0_12, %c0_13, %c0_14, %c0_15], %29 {strides = array<i32>} : memref<1x4x3x288xf32, #tpu.memory_space<vmem>>, vector<1x1x3x288xf32>,
    %30 = tpu.concatenate %14, %15, %17, %18 in 0 : vector<16x288xf32>, vector<16x288xf32>, vector<16x288xf32>, vector<16x288xf32> -> vector<64x288xf32>
    %c1 = arith.constant 1 : index
    %c0_16 = arith.constant 0 : index
    %c0_17 = arith.constant 0 : index
    %31 = vector.load %arg5[%c1, %c0_16, %c0_17] : memref<4x3x64xf32, #tpu.memory_space<vmem>>, vector<1x3x64xf32>
    %32 = vector.shape_cast %31 : vector<1x3x64xf32> to vector<3x64xf32>
    %cst_18 = arith.constant dense<0.000000e+00> : vector<3x288xf32>
    %33 = tpu.matmul %32, %30, %cst_18 {dimension_numbers = #tpu.dot_dimension_numbers<[1], [0], [0], [1], [0, 0, 1, 1], [], []>} : vector<3x64xf32>, vector<64x288xf32>, vector<3x288xf32> -> vector<3x288xf32>
    %34 = math.tanh %33 : vector<3x288xf32>
    %c0_19 = arith.constant 0 : index
    %c1_20 = arith.constant 1 : index
    %c0_21 = arith.constant 0 : index
    %c0_22 = arith.constant 0 : index
    %35 = vector.load %arg6[%c0_19, %c1_20, %c0_21, %c0_22] : memref<1x4x3x288xf32, #tpu.memory_space<vmem>>, vector<1x1x3x288xf32>
    %36 = vector.shape_cast %35 : vector<1x1x3x288xf32> to vector<3x288xf32>
    %37 = vector.shape_cast %34 : vector<3x288xf32> to vector<1x1x3x288xf32>
    tpu.vector_store %arg6[%c0_19, %c1_20, %c0_21, %c0_22], %37 {strides = array<i32>} : memref<1x4x3x288xf32, #tpu.memory_space<vmem>>, vector<1x1x3x288xf32>,
    %38 = tpu.concatenate %16, %17, %19, %20 in 0 : vector<16x288xf32>, vector<16x288xf32>, vector<16x288xf32>, vector<16x288xf32> -> vector<64x288xf32>
    %c2 = arith.constant 2 : index
    %c0_23 = arith.constant 0 : index
    %c0_24 = arith.constant 0 : index
    %39 = vector.load %arg5[%c2, %c0_23, %c0_24] : memref<4x3x64xf32, #tpu.memory_space<vmem>>, vector<1x3x64xf32>
    %40 = vector.shape_cast %39 : vector<1x3x64xf32> to vector<3x64xf32>
    %cst_25 = arith.constant dense<0.000000e+00> : vector<3x288xf32>
    %41 = tpu.matmul %40, %38, %cst_25 {dimension_numbers = #tpu.dot_dimension_numbers<[1], [0], [0], [1], [0, 0, 1, 1], [], []>} : vector<3x64xf32>, vector<64x288xf32>, vector<3x288xf32> -> vector<3x288xf32>
    %42 = math.tanh %41 : vector<3x288xf32>
    %c0_26 = arith.constant 0 : index
    %c2_27 = arith.constant 2 : index
    %c0_28 = arith.constant 0 : index
    %c0_29 = arith.constant 0 : index
    %43 = vector.load %arg6[%c0_26, %c2_27, %c0_28, %c0_29] : memref<1x4x3x288xf32, #tpu.memory_space<vmem>>, vector<1x1x3x288xf32>
    %44 = vector.shape_cast %43 : vector<1x1x3x288xf32> to vector<3x288xf32>
    %45 = vector.shape_cast %42 : vector<3x288xf32> to vector<1x1x3x288xf32>
    tpu.vector_store %arg6[%c0_26, %c2_27, %c0_28, %c0_29], %45 {strides = array<i32>} : memref<1x4x3x288xf32, #tpu.memory_space<vmem>>, vector<1x1x3x288xf32>,
    %46 = tpu.concatenate %17, %18, %20, %21 in 0 : vector<16x288xf32>, vector<16x288xf32>, vector<16x288xf32>, vector<16x288xf32> -> vector<64x288xf32>
    %c3 = arith.constant 3 : index
    %c0_30 = arith.constant 0 : index
    %c0_31 = arith.constant 0 : index
    %47 = vector.load %arg5[%c3, %c0_30, %c0_31] : memref<4x3x64xf32, #tpu.memory_space<vmem>>, vector<1x3x64xf32>
    %48 = vector.shape_cast %47 : vector<1x3x64xf32> to vector<3x64xf32>
    %cst_32 = arith.constant dense<0.000000e+00> : vector<3x288xf32>
    %49 = tpu.matmul %48, %46, %cst_32 {dimension_numbers = #tpu.dot_dimension_numbers<[1], [0], [0], [1], [0, 0, 1, 1], [], []>} : vector<3x64xf32>, vector<64x288xf32>, vector<3x288xf32> -> vector<3x288xf32>
    %50 = math.tanh %49 : vector<3x288xf32>
    %c0_33 = arith.constant 0 : index
    %c3_34 = arith.constant 3 : index
    %c0_35 = arith.constant 0 : index
    %c0_36 = arith.constant 0 : index
    %51 = vector.load %arg6[%c0_33, %c3_34, %c0_35, %c0_36] : memref<1x4x3x288xf32, #tpu.memory_space<vmem>>, vector<1x1x3x288xf32>
    %52 = vector.shape_cast %51 : vector<1x1x3x288xf32> to vector<3x288xf32>
    %53 = vector.shape_cast %50 : vector<3x288xf32> to vector<1x1x3x288xf32>
    tpu.vector_store %arg6[%c0_33, %c3_34, %c0_35, %c0_36], %53 {strides = array<i32>} : memref<1x4x3x288xf32, #tpu.memory_space<vmem>>, vector<1x1x3x288xf32>,
    return
  }
  func.func @transform_0(%arg0: i32) -> (i32, i32, i32) {
    %c0_i32 = arith.constant 0 : i32
    %c0_i32_0 = arith.constant 0 : i32
    %c0_i32_1 = arith.constant 0 : i32
    return %arg0, %c0_i32, %c0_i32_0 : i32, i32, i32
  }
  func.func @transform_1(%arg0: i32) -> (i32, i32) {
    %c0_i32 = arith.constant 0 : i32
    %c0_i32_0 = arith.constant 0 : i32
    %c0_i32_1 = arith.constant 0 : i32
    return %c0_i32, %c0_i32_0 : i32, i32
  }
  func.func @transform_2(%arg0: i32) -> (i32, i32) {
    %c0_i32 = arith.constant 0 : i32
    %c0_i32_0 = arith.constant 0 : i32
    %c0_i32_1 = arith.constant 0 : i32
    return %c0_i32, %c0_i32_0 : i32, i32
  }
  func.func @transform_3(%arg0: i32) -> (i32, i32) {
    %c0_i32 = arith.constant 0 : i32
    %c0_i32_0 = arith.constant 0 : i32
    %c0_i32_1 = arith.constant 0 : i32
    return %c0_i32, %c0_i32_0 : i32, i32
  }
  func.func @transform_4(%arg0: i32) -> (i32, i32, i32) {
    %c0_i32 = arith.constant 0 : i32
    %c0_i32_0 = arith.constant 0 : i32
    %c0_i32_1 = arith.constant 0 : i32
    %c0_i32_2 = arith.constant 0 : i32
    return %c0_i32, %c0_i32_0, %c0_i32_1 : i32, i32, i32
  }
  func.func @transform_5(%arg0: i32) -> (i32, i32, i32, i32) {
    %c0_i32 = arith.constant 0 : i32
    %c0_i32_0 = arith.constant 0 : i32
    %c0_i32_1 = arith.constant 0 : i32
    %c0_i32_2 = arith.constant 0 : i32
    return %arg0, %c0_i32, %c0_i32_0, %c0_i32_1 : i32, i32, i32, i32
  }
}

</mosaic_0001>

<bundles_post_ra>
// kernel: generator32_forward.4
= control target key start
LH: loop header
LB: loop body
LE: loop exit
PB: predicated region body
PF: predicated region fallthrough
CT: control target
= control target key end

     0   :  { %v388_v3 = vmov 0.0   ;;  %vm28_vm0 = vcmask 130048   ;;  %v389_v26 = vmov 1983009808   ;;  %v329_v28 = vlaneseq  ;;  %s466_s1 = inlined_call_operand.vmem [shape: f32[16,1024], index: 1, kind: input, shape index: {}]   ;;  %s467_s0 = inlined_call_operand.vmem [shape: f32[2,16], index: 0, kind: input, shape index: {}]   ;;  %s468_s2 = inlined_call_operand.vmem [shape: f32[2,1024], index: 2, kind: output, shape index: {}]  }
   0x1   :  { %v13_v0 = vld [vmem:[%s466_s1 + $0x8] sm:$0xff]  ;;  %v15_v2 = vld [vmem:[%s466_s1 + $0x18] sm:$0xff]  ;;  %96 = vmatprep.mubr.f32.mxu0 %v388_v3  ;;  %167 = vmatprep.mubr.f32.mxu1 %v388_v3  ;;  %v12_v6 = vld [vmem:[%s466_s1] sm:$0xff]  ;;  %v327_v27 = vunpack.c.l.s4 %v389_v26 }
   0x2   :  { %v21_v1 = vld [vmem:[%s466_s1 + $0x48] sm:$0xff]  ;;  %v23_v5 = vld [vmem:[%s466_s1 + $0x58] sm:$0xff]  ;;  %v20_v7 = vld [vmem:[%s466_s1 + $0x40] sm:$0xff]  ;;  %v330_v30 = vshrl.u32 %v329_v28, 7 }
   0x3   :  { %v370_v4 = vpack.c.bf16 %v21_v1, %v13_v0  ;;  %v374_v8 = vpack.c.bf16 %v23_v5, %v15_v2  ;;  %v372_v9 = vpack.c.bf16 %v20_v7, %v12_v6  ;;  %v14_v10 = vld [vmem:[%s466_s1 + $0x10] sm:$0xff]  ;;  %v11_v12 = vld [vmem:[%s467_s0] sm:$0x3]  ;;  %v17_v14 = vld [vmem:[%s466_s1 + $0x28] sm:$0xff]  ;;  %v328_v29 = vunpack.c.0.s8 %v327_v27 }
   0x4   :  { %v22_v11 = vld [vmem:[%s466_s1 + $0x50] sm:$0xff]  ;;  %v25_v15 = vld [vmem:[%s466_s1 + $0x68] sm:$0xff]  ;;  %v19_v16 = vld [vmem:[%s466_s1 + $0x38] sm:$0xff] }
   0x5   :  { %371 = vmatprep.subr.bf16.mxu0 %v370_v4  ;;  %v376_v13 = vpack.c.bf16 %v22_v11, %v14_v10  ;;  %375 = vmatprep.subr.bf16.mxu1 %v374_v8  ;;  %v378_v17 = vpack.c.bf16 %v25_v15, %v17_v14  ;;  %v27_v18 = vld [vmem:[%s466_s1 + $0x78] sm:$0xff]  ;;  %v16_v19 = vld [vmem:[%s466_s1 + $0x20] sm:$0xff]  ;;  %v18_v23 = vld [vmem:[%s466_s1 + $0x30] sm:$0xff]  ;;  %v331_v32 = vsub.s32 %v328_v29, %v330_v30 }
   0x6   :  { %373 = vmatpush1.bf16.msra.mxu0 %v372_v9  ;;  %v24_v20 = vld [vmem:[%s466_s1 + $0x60] sm:$0xff]  ;;  %v382_v21 = vpack.c.bf16 %v27_v18, %v19_v16  ;;  %v26_v24 = vld [vmem:[%s466_s1 + $0x70] sm:$0xff] }
   0x7   :  { %377 = vmatpush1.bf16.msra.mxu1 %v376_v13  ;;  %v380_v22 = vpack.c.bf16 %v24_v20, %v16_v19  ;;  %379 = vmatprep.subr.bf16.mxu0 %v378_v17  ;;  %v384_v25 = vpack.c.bf16 %v26_v24, %v18_v23 }
   0x8   :  { %383 = vmatprep.subr.bf16.mxu1 %v382_v21 }
   0x9   :  { %366 = vmatmul.mubr.msk.f32.vlgmr.msra.gmra.mrb[0].mxu0 %vm28_vm0, %v11_v12 }
   0xa   :  { %367 = vmatmul.mubr.msk.f32.vlgmr.msra.gmra.mrb[0].mxu1 %vm28_vm0, %v11_v12  ;;  %381 = vmatpush1.bf16.msra.mxu0 %v380_v22 }
   0xb   :  { %385 = vmatpush1.bf16.msra.mxu1 %v384_v25  ;;  %238 = vmatprep.mubr.f32.mxu0 %v388_v3 }
   0xc   :  { %309 = vmatprep.mubr.f32.mxu1 %v388_v3 }
   0xd   :  { %368 = vmatmul.mubr.msk.f32.vlgmr.msra.gmra.mrb[2].mxu0 %vm28_vm0, %v11_v12 }
   0xe   :  { %369 = vmatmul.mubr.msk.f32.vlgmr.msra.gmra.mrb[2].mxu1 %vm28_vm0, %v11_v12 }
  0xdc   :  { %v98_v31 = vpop.f32.mrb[0].mxu0 }
  0xdd   :  { %v169_v33 = vpop.f32.mrb[0].mxu1  ;;  %v100_v34 = vpop.f32.mrb[1].mxu0 }
  0xde   :  { %v324_v35 = vcombine.low %v98_v31, %v100_v34  ;;  %v171_v36 = vpop.f32.mrb[1].mxu1 }
  0xdf   :  { %v325_v37 = vcombine.low %v169_v33, %v171_v36 }
  0xe0   :  { %v332_v38 = vrot.slane %v324_v35, %v331_v32  ;;  %v240_v39 = vpop.f32.mrb[2].mxu0 }
  0xe1   :  { %v339_v40 = vrot.slane %v325_v37, %v331_v32  ;;  %v311_v41 = vpop.f32.mrb[2].mxu1  ;;  %v242_v42 = vpop.f32.mrb[3].mxu0 }
  0xe2   :  { %v341_v43 = vcombine.low %v240_v39, %v242_v42  ;;  %v313_v44 = vpop.f32.mrb[3].mxu1 }
  0xe3   :  { %v340_v45 = vcombine.low %v332_v38, %v339_v40  ;;  %v342_v46 = vcombine.low %v311_v41, %v313_v44 }
  0xe4   :  { %v349_v47 = vrot.slane %v341_v43, %v331_v32 }
  0xe5   :  { %360 = vst [vmem:[%s468_s2] sm:$0xff] %v340_v45  ;;  %v356_v48 = vrot.slane %v342_v46, %v331_v32 }
  0xe7   :  { %v357_v49 = vcombine.low %v349_v47, %v356_v48 }
  0xe9   :  { %361 = vst [vmem:[%s468_s2 + $0x8] sm:$0xff] %v357_v49 }

// kernel: generator32_forward.5
= control target key start
LH: loop header
LB: loop body
LE: loop exit
PB: predicated region body
PF: predicated region fallthrough
CT: control target
= control target key end

     0   :  { %s1764_s18 = smov 0   ;;  %s2140_s0 = inlined_call_operand.vmem [shape: f32[2,64,38], index: 0, kind: input, shape index: {}]   ;;  %s2141_s1 = inlined_call_operand.vmem [shape: f32[64,1], index: 1, kind: input, shape index: {}]   ;;  %s2142_s2 = inlined_call_operand.vmem [shape: f32[64,1], index: 2, kind: input, shape index: {}]   ;;  %s2143_s3 = inlined_call_operand.vmem [shape: f32[1,38], index: 3, kind: input, shape index: {}]   ;;  %s2144_s4 = inlined_call_operand.vmem [shape: f32[4,32,256], index: 4, kind: input, shape index: {}]   ;;  %s2145_s5 = inlined_call_operand.vmem [shape: f32[2,4,32,24], index: 5, kind: output, shape index: {}]  }
   0x1 LB: > { %s1114_s19 = sadd.s32 4294967295, %s1728_s18   ;;  %p1118_p0 = scmp.ge.s32.totalorder %s1728_s18, 1  ;;  %s1728_s18 = sphi %s1764_s18, %s15_s18  }
   0x2   : > { %p187_p1 = scmp.lt.s32.totalorder %s1728_s18, 3 }
   0x4   : > { %p188_p2 = pnand %p1118_p0, %p187_p1 }
   0x5   : > { %v289_v0 = vld [vmem:[%s2142_s2] sm:$0xff] (!%p188_p2)  ;;  %v1730_v2 = vmov (!%p188_p2), 0   ;;  %v290_v3 = vld [vmem:[%s2142_s2 + $0x8] sm:$0xff] (!%p188_p2)  ;;  %v236_v5 = vld [vmem:[%s2141_s1 + $0x18] sm:$0xff] (!%p188_p2)  ;;  %p215_p3 = scmp.lt.s32.totalorder (!%p188_p2), %s1114_s19, 1  ;;  %s1731_s10 = smov (!%p188_p2), 122  }
   0x6   : > { %191 = sbr.rel (%p188_p2) target bundleno = 700 (0x2bc), region = 40  ;;  %v233_v1 = vld [vmem:[%s2141_s1] sm:$0xff] (!%p188_p2)  ;;  %1481 = vset.pattern.permute.xlu1 (!%p188_p2), %v1730_v2  ;;  %1480 = vset.pattern.permute.xlu0 (!%p188_p2), %v1730_v2  ;;  %v234_v4 = vld [vmem:[%s2141_s1 + $0x8] sm:$0xff] (!%p188_p2)  ;;  %v235_v6 = vld [vmem:[%s2141_s1 + $0x10] sm:$0xff] (!%p188_p2)  ;;  %s1732_s11 = smov (!%p188_p2), 121   ;;  %vm541_vm0 = vcmask (!%p188_p2), 195584  }
   0x7   : > { %299 = vperm.xlu1 (!%p188_p2), %1481, %v289_v0   ;;  %243 = vperm.xlu0 (!%p188_p2), %1480, %v233_v1   ;;  %v292_v7 = vld [vmem:[%s2142_s2 + $0x18] sm:$0xff] (!%p188_p2)  ;;  %v291_v8 = vld [vmem:[%s2142_s2 + $0x10] sm:$0xff] (!%p188_p2)  ;;  %v238_v9 = vld [vmem:[%s2141_s1 + $0x28] sm:$0xff] (!%p188_p2)  ;;  %s1733_s12 = smov (!%p188_p2), 127  }
   0x8   : > { %v237_v10 = vld [vmem:[%s2141_s1 + $0x20] sm:$0xff] (!%p188_p2)  ;;  %v294_v11 = vld [vmem:[%s2142_s2 + $0x28] sm:$0xff] (!%p188_p2)  ;;  %v240_v13 = vld [vmem:[%s2141_s1 + $0x38] sm:$0xff] (!%p188_p2) }
   0x9   : > { %v293_v12 = vld [vmem:[%s2142_s2 + $0x20] sm:$0xff] (!%p188_p2)  ;;  %v239_v14 = vld [vmem:[%s2141_s1 + $0x30] sm:$0xff] (!%p188_p2)  ;;  %v296_v15 = vld [vmem:[%s2142_s2 + $0x38] sm:$0xff] (!%p188_p2) }
   0xa   : > { %v295_v16 = vld [vmem:[%s2142_s2 + $0x30] sm:$0xff] (!%p188_p2)  ;;  %v1123_v28 = vld [vmem:[%s2143_s3] ss:$0 sm:$0xff] (!%p188_p2) }
   0xb   : > { %304 = vperm.xlu1 (!%p188_p2), %1481, %v290_v3   ;;  %248 = vperm.xlu0 (!%p188_p2), %1480, %v234_v4  }
   0xd   : > { %s2147_s19 = smov (!%p215_p3, %s1114_s19), 1 }
   0xe   : > { %s1162_s29 = sshll.u32 %s2147_s19, 6  ;;  %s1163_s8 = sshll.u32 %s2147_s19, 7 }
   0xf   : > { %258 = vperm.xlu1 %1481, %v236_v5   ;;  %253 = vperm.xlu0 %1480, %v235_v6   ;;  %s1830_s7 = scalar_lea.vmem %s2140_s0, %s1162_s29 }
  0x10   : > { %v225_v17 = vld [vmem:[%s1830_s7] sm:$0xff]  ;;  %v226_v21 = vld [vmem:[%s1830_s7 + $0x8] sm:$0xff]  ;;  %v228_v30 = vld [vmem:[%s1830_s7 + $0x18] sm:$0xff] }
  0x11   : > { %v227_v32 = vld [vmem:[%s1830_s7 + $0x10] sm:$0xff]  ;;  %v230_v47 = vld [vmem:[%s1830_s7 + $0x28] sm:$0xff]  ;;  %v229_v49 = vld [vmem:[%s1830_s7 + $0x20] sm:$0xff] }
  0x12   : > { %v232_v63 = vld [vmem:[%s1830_s7 + $0x38] sm:$0xff]  ;;  %v231_v1 = vld [vmem:[%s1830_s7 + $0x30] sm:$0xff] }
  0x13   : > { %314 = vperm.xlu1 %1481, %v292_v7   ;;  %309 = vperm.xlu0 %1480, %v291_v8  }
  0x17   : > { %268 = vperm.xlu1 %1481, %v238_v9   ;;  %263 = vperm.xlu0 %1480, %v237_v10  }
  0x1b   : > { %324 = vperm.xlu1 %1481, %v294_v11   ;;  %319 = vperm.xlu0 %1480, %v293_v12  }
  0x1f   : > { %278 = vperm.xlu1 %1481, %v240_v13   ;;  %273 = vperm.xlu0 %1480, %v239_v14  }
  0x23   : > { %334 = vperm.xlu1 %1481, %v296_v15   ;;  %329 = vperm.xlu0 %1480, %v295_v16  }
  0x86   : > { %v300_v18 = vpop.permute.xlu1 %299  ;;  %v244_v19 = vpop.permute.xlu0 %243 }
  0x87   : > { %v281_v20 = vmul.f32 %v244_v19, %v225_v17 }
  0x89   : > { %v337_v22 = vadd.f32 %v300_v18, %v281_v20 }
  0x8a   : > { %v305_v23 = vpop.permute.xlu1 %304  ;;  %v249_v24 = vpop.permute.xlu0 %248 }
  0x8b   : > { %v282_v25 = vmul.f32 %v249_v24, %v226_v21  ;;  %v345_v26 = vmax.f32 %v337_v22, 0.0 }
  0x8d   : > { %v338_v27 = vadd.f32 %v305_v23, %v282_v25  ;;  %v1839_v34 = vmul.f32 %v1123_v28, %v345_v26 }
  0x8e   : > { %v259_v29 = vpop.permute.xlu1 %258  ;;  %v254_v31 = vpop.permute.xlu0 %253 }
  0x8f   : > { %v346_v33 = vmax.f32 %v338_v27, 0.0  ;;  %v284_v36 = vmul.f32 %v259_v29, %v228_v30  ;;  %v283_v37 = vmul.f32 %v254_v31, %v227_v32 }
  0x91   : > { %v1841_v35 = vmul.f32 %v1123_v28, %v346_v33 }
  0x92   : > { %v315_v38 = vpop.permute.xlu1 %314  ;;  %v310_v39 = vpop.permute.xlu0 %309 }
  0x93   : > { %v340_v40 = vadd.f32 %v315_v38, %v284_v36  ;;  %v339_v41 = vadd.f32 %v310_v39, %v283_v37  ;;  %v1482_v42 = vpack.i.bf16 %v1841_v35, %v1839_v34  ;;  %v1342_v43 = vpack.c.bf16 %v1841_v35, %v1839_v34 }
  0x95   : > { %v348_v44 = vmax.f32 %v340_v40, 0.0  ;;  %v347_v45 = vmax.f32 %v339_v41, 0.0  ;;  %1483 = vrot.lane.b32.xlu0 %v1482_v42, %s1731_s10 }
  0x96   : > { %v269_v46 = vpop.permute.xlu1 %268  ;;  %v264_v48 = vpop.permute.xlu0 %263 }
  0x97   : > { %v363_v50 = vmul.f32 %v1123_v28, %v348_v44  ;;  %v362_v51 = vmul.f32 %v1123_v28, %v347_v45  ;;  %v286_v52 = vmul.f32 %v269_v46, %v230_v47  ;;  %v285_v53 = vmul.f32 %v264_v48, %v229_v49 }
  0x99   : > { %v1487_v54 = vpack.i.bf16 %v363_v50, %v362_v51  ;;  %v1346_v55 = vpack.c.bf16 %v363_v50, %v362_v51  ;;  %v449_v50 = vld [vmem:[%s2144_s4 + $0x8] sm:$0xff] }
  0x9a   : > { %v325_v56 = vpop.permute.xlu1 %324  ;;  %v320_v57 = vpop.permute.xlu0 %319  ;;  %520 = vmatprep.mubr.f32.mxu0 %v449_v50 }
  0x9b   : > { %v342_v58 = vadd.f32 %v325_v56, %v286_v52  ;;  %v341_v59 = vadd.f32 %v320_v57, %v285_v53  ;;  %1488 = vrot.lane.b32.xlu1 %v1487_v54, %s1731_s10 }
  0x9d   : > { %v350_v60 = vmax.f32 %v342_v58, 0.0  ;;  %v349_v61 = vmax.f32 %v341_v59, 0.0 }
  0x9e   : > { %v279_v62 = vpop.permute.xlu1 %278  ;;  %v274_v0 = vpop.permute.xlu0 %273 }
  0x9f   : > { %v365_v2 = vmul.f32 %v1123_v28, %v350_v60  ;;  %v364_v3 = vmul.f32 %v1123_v28, %v349_v61  ;;  %v288_v4 = vmul.f32 %v279_v62, %v232_v63  ;;  %v287_v5 = vmul.f32 %v274_v0, %v231_v1  ;;  %v1125_v63 = vld [vmem:[%s2144_s4 + $0x48] sm:$0xff] }
  0xa0   : > { %691 = vmatprep.mubr.f32.mxu1 %v1125_v63 }
  0xa1   : > { %v1492_v6 = vpack.i.bf16 %v365_v2, %v364_v3  ;;  %v1350_v7 = vpack.c.bf16 %v365_v2, %v364_v3 }
  0xa2   : > { %v335_v8 = vpop.permute.xlu1 %334  ;;  %v330_v9 = vpop.permute.xlu0 %329 }
  0xa3   : > { %v344_v10 = vadd.f32 %v335_v8, %v288_v4  ;;  %v343_v11 = vadd.f32 %v330_v9, %v287_v5  ;;  %1493 = vrot.lane.b32.xlu0 %v1492_v6, %s1731_s10  ;;  %v448_v4 = vld [vmem:[%s2144_s4] sm:$0xff]  ;;  %v451_v5 = vld [vmem:[%s2144_s4 + $0x18] sm:$0xff] }
  0xa4   : > { %v452_v8 = vld [vmem:[%s2144_s4 + $0x20] sm:$0xff]  ;;  %v455_v9 = vld [vmem:[%s2144_s4 + $0x38] sm:$0xff] }
  0xa5   : > { %v352_v12 = vmax.f32 %v344_v10, 0.0  ;;  %v351_v13 = vmax.f32 %v343_v11, 0.0  ;;  %v454_v10 = vld [vmem:[%s2144_s4 + $0x30] sm:$0xff]  ;;  %v1137_v11 = vld [vmem:[%s2144_s4 + $0x88] sm:$0xff] }
  0xa7   : > { %v367_v14 = vmul.f32 %v1123_v28, %v352_v12  ;;  %v366_v15 = vmul.f32 %v1123_v28, %v351_v13  ;;  %1503 = vrot.lane.b32.xlu0 %v1482_v42, %s1732_s11 }
  0xa9   : > { %v1497_v16 = vpack.i.bf16 %v367_v14, %v366_v15  ;;  %v1354_v17 = vpack.c.bf16 %v367_v14, %v366_v15 }
  0xab   : > { %1498 = vrot.lane.b32.xlu1 %v1497_v16, %s1731_s10  ;;  %1513 = vrot.lane.b32.xlu0 %v1487_v54, %s1732_s11 }
  0xaf   : > { %1508 = vrot.lane.b32.xlu1 %v1482_v42, %s1733_s12  ;;  %1523 = vrot.lane.b32.xlu0 %v1492_v6, %s1732_s11 }
  0xb3   : > { %1518 = vrot.lane.b32.xlu1 %v1487_v54, %s1733_s12  ;;  %1533 = vrot.lane.b32.xlu0 %v1497_v16, %s1732_s11 }
  0xb7   : > { %1528 = vrot.lane.b32.xlu1 %v1492_v6, %s1733_s12  ;;  %v450_v6 = vld [vmem:[%s2144_s4 + $0x10] sm:$0xff] }
  0xbb   : > { %1538 = vrot.lane.b32.xlu1 %v1497_v16, %s1733_s12 }
 0x107   : > { %v1863_v18 = vpop.permute.xlu0 %1483 }
 0x108   : > { %v1486_v19 = vunpack.i.h.bf16 %v1863_v18  ;;  %v1485_v20 = vunpack.i.l.bf16 %v1863_v18  ;;  %1543 = vrot.lane.b32.xlu0 %v1863_v18, %s1733_s12 }
 0x10a   : > { %v1867_v21 = vpack.c.bf16 %v1486_v19, %v1485_v20 }
 0x10c   : > { %1341 = vmatprep.subr.bf16.mxu0 %v1867_v21 }
 0x10d   : > { %v1872_v22 = vpop.permute.xlu1 %1488  ;;  %1343 = vmatpush3.bf16.msra.mxu0 %v1342_v43 }
 0x10e   : > { %v1491_v23 = vunpack.i.h.bf16 %v1872_v22  ;;  %v1490_v24 = vunpack.i.l.bf16 %v1872_v22  ;;  %1548 = vrot.lane.b32.xlu1 %v1872_v22, %s1733_s12 }
 0x110   : > { %v1876_v25 = vpack.c.bf16 %v1491_v23, %v1490_v24 }
 0x112   : > { %1345 = vmatprep.subr.bf16.mxu0 %v1876_v25 }
 0x113   : > { %1347 = vmatpush3.bf16.msra.mxu0 %v1346_v55 }
 0x115   : > { %v1881_v26 = vpop.permute.xlu0 %1493 }
 0x116   : > { %v1496_v27 = vunpack.i.h.bf16 %v1881_v26  ;;  %v1495_v28 = vunpack.i.l.bf16 %v1881_v26  ;;  %1553 = vrot.lane.b32.xlu0 %v1881_v26, %s1733_s12 }
 0x118   : > { %v1885_v29 = vpack.c.bf16 %v1496_v27, %v1495_v28 }
 0x119   : > { %v1887_v30 = vpop.permute.xlu0 %1503 }
 0x11a   : > { %v1506_v31 = vunpack.i.h.bf16 %v1887_v30  ;;  %v1505_v32 = vunpack.i.l.bf16 %v1887_v30  ;;  %1349 = vmatprep.subr.bf16.mxu0 %v1885_v29  ;;  %1563 = vrot.lane.b32.xlu0 %v1887_v30, %s1733_s12 }
 0x11b   : > { %1351 = vmatpush3.bf16.msra.mxu0 %v1350_v7  ;;  %v453_v7 = vld [vmem:[%s2144_s4 + $0x28] sm:$0xff] }
 0x11c   : > { %v1915_v46 = vpack.c.bf16 %v1506_v31, %v1505_v32 }
 0x11d   : > { %v1894_v33 = vpop.permute.xlu1 %1498  ;;  %v1896_v34 = vpop.permute.xlu0 %1513 }
 0x11e   : > { %v1501_v35 = vunpack.i.h.bf16 %v1894_v33  ;;  %v1500_v36 = vunpack.i.l.bf16 %v1894_v33  ;;  %v1516_v37 = vunpack.i.h.bf16 %v1896_v34  ;;  %v1515_v38 = vunpack.i.l.bf16 %v1896_v34  ;;  %1558 = vrot.lane.b32.xlu1 %v1894_v33, %s1733_s12  ;;  %1573 = vrot.lane.b32.xlu0 %v1896_v34, %s1733_s12 }
 0x120   : > { %v1904_v39 = vpack.c.bf16 %v1501_v35, %v1500_v36  ;;  %v1930_v55 = vpack.c.bf16 %v1516_v37, %v1515_v38 }
 0x121   : > { %v1509_v40 = vpop.permute.xlu1 %1508  ;;  %v1906_v41 = vpop.permute.xlu0 %1523 }
 0x122   : > { %v1511_v42 = vunpack.i.h.bf16 %v1509_v40  ;;  %v1510_v43 = vunpack.i.l.bf16 %v1509_v40  ;;  %v1526_v44 = vunpack.i.h.bf16 %v1906_v41  ;;  %v1525_v45 = vunpack.i.l.bf16 %v1906_v41  ;;  %1353 = vmatprep.subr.bf16.mxu0 %v1904_v39  ;;  %1568 = vrot.lane.b32.xlu1 %v1509_v40, %s1733_s12 }
 0x123   : > { %1355 = vmatpush3.bf16.msra.mxu0 %v1354_v17  ;;  %1583 = vrot.lane.b32.xlu0 %v1906_v41, %s1733_s12 }
 0x124   : > { %v1917_v47 = vpack.c.bf16 %v1511_v42, %v1510_v43  ;;  %1357 = vmatprep.subr.bf16.mxu0 %v1915_v46  ;;  %v1939_v60 = vpack.c.bf16 %v1526_v44, %v1525_v45 }
 0x125   : > { %v1519_v48 = vpop.permute.xlu1 %1518  ;;  %v1920_v49 = vpop.permute.xlu0 %1533 }
 0x126   : > { %v1521_v51 = vunpack.i.h.bf16 %v1519_v48  ;;  %v1520_v52 = vunpack.i.l.bf16 %v1519_v48  ;;  %v1536_v53 = vunpack.i.h.bf16 %v1920_v49  ;;  %v1535_v54 = vunpack.i.l.bf16 %v1920_v49  ;;  %1578 = vrot.lane.b32.xlu1 %v1519_v48, %s1733_s12 }
 0x127   : > { %1359 = vmatpush3.bf16.msra.mxu0 %v1917_v47  ;;  %1593 = vrot.lane.b32.xlu0 %v1920_v49, %s1733_s12 }
 0x128   : > { %v1933_v56 = vpack.c.bf16 %v1521_v51, %v1520_v52  ;;  %1361 = vmatprep.subr.bf16.mxu0 %v1930_v55  ;;  %v1951_v2 = vpack.c.bf16 %v1536_v53, %v1535_v54 }
 0x129   : > { %v1529_v57 = vpop.permute.xlu1 %1528 }
 0x12a   : > { %v1531_v58 = vunpack.i.h.bf16 %v1529_v57  ;;  %v1530_v59 = vunpack.i.l.bf16 %v1529_v57  ;;  %1588 = vrot.lane.b32.xlu1 %v1529_v57, %s1733_s12 }
 0x12b   : > { %1363 = vmatpush3.bf16.msra.mxu0 %v1933_v56  ;;  %1603 = vrot.lane.b32.xlu0 %v1863_v18, %s1731_s10 }
 0x12c   : > { %v1942_v61 = vpack.c.bf16 %v1531_v58, %v1530_v59  ;;  %1365 = vmatprep.subr.bf16.mxu0 %v1939_v60 }
 0x12d   : > { %v1539_v62 = vpop.permute.xlu1 %1538 }
 0x12e   : > { %v1541_v0 = vunpack.i.h.bf16 %v1539_v62  ;;  %v1540_v1 = vunpack.i.l.bf16 %v1539_v62  ;;  %1598 = vrot.lane.b32.xlu1 %v1539_v62, %s1733_s12 }
 0x12f   : > { %1367 = vmatpush3.bf16.msra.mxu0 %v1942_v61  ;;  %1613 = vrot.lane.b32.xlu0 %v1872_v22, %s1731_s10 }
 0x130   : > { %v1954_v3 = vpack.c.bf16 %v1541_v0, %v1540_v1  ;;  %1369 = vmatprep.subr.bf16.mxu0 %v1951_v2 }
 0x132   : > { %1608 = vrot.lane.b32.xlu1 %v1863_v18, %s1732_s11 }
 0x133   : > { %1371 = vmatpush3.bf16.msra.mxu0 %v1954_v3  ;;  %1623 = vrot.lane.b32.xlu0 %v1881_v26, %s1731_s10 }
 0x136   : > { %521 = vmatmul.mubr.f32.vlgmr.msra.gmra.mrb[0].mxu0 %v448_v4  ;;  %1618 = vrot.lane.b32.xlu1 %v1872_v22, %s1732_s11 }
 0x137   : > { %1633 = vrot.lane.b32.xlu0 %v1894_v33, %s1731_s10  ;;  %525 = vmatprep.mubr.f32.mxu0 %v451_v5 }
 0x13a   : > { %1628 = vrot.lane.b32.xlu1 %v1881_v26, %s1732_s11  ;;  %526 = vmatmul.mubr.f32.gmra.mrb[2].mxu0 %v450_v6 }
 0x13b   : > { %1643 = vrot.lane.b32.xlu0 %v1887_v30, %s1731_s10  ;;  %530 = vmatprep.mubr.f32.mxu0 %v453_v7 }
 0x13e   : > { %1638 = vrot.lane.b32.xlu1 %v1894_v33, %s1732_s11  ;;  %531 = vmatmul.mubr.f32.gmra.mrb[4].mxu0 %v452_v8 }
 0x13f   : > { %1653 = vrot.lane.b32.xlu0 %v1509_v40, %s1731_s10  ;;  %535 = vmatprep.mubr.f32.mxu0 %v455_v9 }
 0x142   : > { %1648 = vrot.lane.b32.xlu1 %v1887_v30, %s1732_s11  ;;  %536 = vmatmul.mubr.f32.gmra.mrb[6].mxu0 %v454_v10 }
 0x143   : > { %1663 = vrot.lane.b32.xlu0 %v1896_v34, %s1731_s10  ;;  %862 = vmatprep.mubr.f32.mxu0 %v1137_v11 }
 0x146   : > { %1658 = vrot.lane.b32.xlu1 %v1509_v40, %s1732_s11 }
 0x147   : > { %1673 = vrot.lane.b32.xlu0 %v1519_v48, %s1731_s10 }
 0x14a   : > { %1668 = vrot.lane.b32.xlu1 %v1896_v34, %s1732_s11 }
 0x14b   : > { %1683 = vrot.lane.b32.xlu0 %v1906_v41, %s1731_s10 }
 0x14e   : > { %1678 = vrot.lane.b32.xlu1 %v1519_v48, %s1732_s11 }
 0x14f   : > { %1693 = vrot.lane.b32.xlu0 %v1529_v57, %s1731_s10 }
 0x152   : > { %1688 = vrot.lane.b32.xlu1 %v1906_v41, %s1732_s11 }
 0x153   : > { %1703 = vrot.lane.b32.xlu0 %v1920_v49, %s1731_s10 }
 0x156   : > { %1698 = vrot.lane.b32.xlu1 %v1529_v57, %s1732_s11 }
 0x157   : > { %1713 = vrot.lane.b32.xlu0 %v1539_v62, %s1731_s10 }
 0x15a   : > { %1708 = vrot.lane.b32.xlu1 %v1920_v49, %s1732_s11 }
 0x15e   : > { %1718 = vrot.lane.b32.xlu1 %v1539_v62, %s1732_s11  ;;  %s2103_s11 = scalar_lea.vmem %s2145_s5, %s1163_s8 }
 0x17a   : > { %v1544_v12 = vpop.permute.xlu0 %1543 }
 0x17b   : > { %v1546_v13 = vunpack.i.h.bf16 %v1544_v12  ;;  %v1545_v14 = vunpack.i.l.bf16 %v1544_v12 }
 0x17d   : > { %v1372_v15 = vpack.c.bf16 %v1546_v13, %v1545_v14 }
 0x17f   : > { %1373 = vmatprep.subr.bf16.mxu1 %v1372_v15 }
 0x180   : > { %v1549_v16 = vpop.permute.xlu1 %1548  ;;  %1375 = vmatpush3.bf16.msra.mxu1 %v1917_v47 }
 0x181   : > { %v1551_v17 = vunpack.i.h.bf16 %v1549_v16  ;;  %v1550_v18 = vunpack.i.l.bf16 %v1549_v16 }
 0x183   : > { %v1376_v19 = vpack.c.bf16 %v1551_v17, %v1550_v18 }
 0x185   : > { %1377 = vmatprep.subr.bf16.mxu1 %v1376_v19 }
 0x186   : > { %1379 = vmatpush3.bf16.msra.mxu1 %v1933_v56 }
 0x188   : > { %v1554_v20 = vpop.permute.xlu0 %1553 }
 0x189   : > { %v1556_v22 = vunpack.i.h.bf16 %v1554_v20  ;;  %v1555_v23 = vunpack.i.l.bf16 %v1554_v20  ;;  %v1124_v20 = vld [vmem:[%s2144_s4 + $0x40] sm:$0xff] }
 0x18b   : > { %v1380_v24 = vpack.c.bf16 %v1556_v22, %v1555_v23  ;;  %v1127_v23 = vld [vmem:[%s2144_s4 + $0x58] sm:$0xff] }
 0x18c   : > { %v1564_v26 = vpop.permute.xlu0 %1563 }
 0x18d   : > { %1381 = vmatprep.subr.bf16.mxu1 %v1380_v24  ;;  %v1566_v27 = vunpack.i.h.bf16 %v1564_v26  ;;  %v1565_v28 = vunpack.i.l.bf16 %v1564_v26 }
 0x18e   : > { %1383 = vmatpush3.bf16.msra.mxu1 %v1942_v61 }
 0x18f   : > { %v1388_v35 = vpack.c.bf16 %v1566_v27, %v1565_v28 }
 0x190   : > { %v1559_v30 = vpop.permute.xlu1 %1558  ;;  %v1574_v31 = vpop.permute.xlu0 %1573 }
 0x191   : > { %v1561_v32 = vunpack.i.h.bf16 %v1559_v30  ;;  %v1560_v33 = vunpack.i.l.bf16 %v1559_v30  ;;  %v1576_v38 = vunpack.i.h.bf16 %v1574_v31  ;;  %v1575_v40 = vunpack.i.l.bf16 %v1574_v31  ;;  %v1126_v31 = vld [vmem:[%s2144_s4 + $0x50] sm:$0xff] }
 0x193   : > { %v1384_v34 = vpack.c.bf16 %v1561_v32, %v1560_v33  ;;  %v1392_v49 = vpack.c.bf16 %v1576_v38, %v1575_v40  ;;  %v1128_v40 = vld [vmem:[%s2144_s4 + $0x60] sm:$0xff] }
 0x194   : > { %v1569_v36 = vpop.permute.xlu1 %1568 }
 0x195   : > { %v1584_v37 = vpop.permute.xlu0 %1583  ;;  %v1571_v41 = vunpack.i.h.bf16 %v1569_v36  ;;  %v1570_v42 = vunpack.i.l.bf16 %v1569_v36  ;;  %1385 = vmatprep.subr.bf16.mxu1 %v1384_v34  ;;  %v1129_v34 = vld [vmem:[%s2144_s4 + $0x68] sm:$0xff] }
 0x196   : > { %1387 = vmatpush3.bf16.msra.mxu1 %v1954_v3  ;;  %v1586_v44 = vunpack.i.h.bf16 %v1584_v37  ;;  %v1585_v45 = vunpack.i.l.bf16 %v1584_v37 }
 0x197   : > { %v1390_v43 = vpack.c.bf16 %v1571_v41, %v1570_v42  ;;  %1389 = vmatprep.subr.bf16.mxu1 %v1388_v35 }
 0x198   : > { %v1579_v47 = vpop.permute.xlu1 %1578  ;;  %v1396_v53 = vpack.c.bf16 %v1586_v44, %v1585_v45 }
 0x199   : > { %v1594_v48 = vpop.permute.xlu0 %1593  ;;  %v1581_v50 = vunpack.i.h.bf16 %v1579_v47  ;;  %v1580_v51 = vunpack.i.l.bf16 %v1579_v47 }
 0x19a   : > { %1391 = vmatpush3.bf16.msra.mxu1 %v1390_v43  ;;  %v1596_v54 = vunpack.i.h.bf16 %v1594_v48  ;;  %v1595_v56 = vunpack.i.l.bf16 %v1594_v48  ;;  %v1131_v43 = vld [vmem:[%s2144_s4 + $0x78] sm:$0xff] }
 0x19b   : > { %v1394_v52 = vpack.c.bf16 %v1581_v50, %v1580_v51  ;;  %1393 = vmatprep.subr.bf16.mxu1 %v1392_v49  ;;  %v1130_v49 = vld [vmem:[%s2144_s4 + $0x70] sm:$0xff] }
 0x19c   : > { %v1589_v57 = vpop.permute.xlu1 %1588  ;;  %v1400_v3 = vpack.c.bf16 %v1596_v54, %v1595_v56 }
 0x19d   : > { %v1604_v58 = vpop.permute.xlu0 %1603  ;;  %v1591_v59 = vunpack.i.h.bf16 %v1589_v57  ;;  %v1590_v61 = vunpack.i.l.bf16 %v1589_v57 }
 0x19e   : > { %v1606_v62 = vunpack.i.h.bf16 %v1604_v58  ;;  %v1605_v63 = vunpack.i.l.bf16 %v1604_v58  ;;  %1395 = vmatpush3.bf16.msra.mxu1 %v1394_v52  ;;  %v1149_v52 = vld [vmem:[%s2144_s4 + $0xc8] sm:$0xff] }
 0x19f   : > { %v1398_v0 = vpack.c.bf16 %v1591_v59, %v1590_v61  ;;  %1397 = vmatprep.subr.bf16.mxu1 %v1396_v53 }
 0x1a0   : > { %v1404_v1 = vpack.c.bf16 %v1606_v62, %v1605_v63  ;;  %v1599_v4 = vpop.permute.xlu1 %1598 }
 0x1a1   : > { %v1614_v5 = vpop.permute.xlu0 %1613  ;;  %v1601_v6 = vunpack.i.h.bf16 %v1599_v4  ;;  %v1600_v7 = vunpack.i.l.bf16 %v1599_v4 }
 0x1a2   : > { %v1616_v8 = vunpack.i.h.bf16 %v1614_v5  ;;  %v1615_v9 = vunpack.i.l.bf16 %v1614_v5  ;;  %1405 = vmatprep.subr.bf16.mxu0 %v1404_v1  ;;  %1399 = vmatpush3.bf16.msra.mxu1 %v1398_v0 }
 0x1a3   : > { %1407 = vmatpush3.bf16.msra.mxu0 %v1867_v21  ;;  %v1402_v10 = vpack.c.bf16 %v1601_v6, %v1600_v7  ;;  %1401 = vmatprep.subr.bf16.mxu1 %v1400_v3 }
 0x1a4   : > { %v1408_v11 = vpack.c.bf16 %v1616_v8, %v1615_v9  ;;  %v1609_v12 = vpop.permute.xlu1 %1608 }
 0x1a5   : > { %v1624_v13 = vpop.permute.xlu0 %1623  ;;  %v1611_v14 = vunpack.i.h.bf16 %v1609_v12  ;;  %v1610_v15 = vunpack.i.l.bf16 %v1609_v12 }
 0x1a6   : > { %v1626_v16 = vunpack.i.h.bf16 %v1624_v13  ;;  %v1625_v17 = vunpack.i.l.bf16 %v1624_v13  ;;  %1409 = vmatprep.subr.bf16.mxu0 %v1408_v11  ;;  %1403 = vmatpush3.bf16.msra.mxu1 %v1402_v10 }
 0x1a7   : > { %1411 = vmatpush3.bf16.msra.mxu0 %v1876_v25  ;;  %v1436_v18 = vpack.c.bf16 %v1611_v14, %v1610_v15 }
 0x1a8   : > { %v1412_v19 = vpack.c.bf16 %v1626_v16, %v1625_v17  ;;  %v1619_v21 = vpop.permute.xlu1 %1618 }
 0x1a9   : > { %v1634_v22 = vpop.permute.xlu0 %1633  ;;  %v1621_v24 = vunpack.i.h.bf16 %v1619_v21  ;;  %v1620_v26 = vunpack.i.l.bf16 %v1619_v21  ;;  %1437 = vmatprep.subr.bf16.mxu1 %v1436_v18  ;;  %692 = vmatmul.mubr.f32.vlgmr.msra.gmra.mrb[0].mxu1 %v1124_v20 }
 0x1aa   : > { %v1636_v27 = vunpack.i.h.bf16 %v1634_v22  ;;  %v1635_v28 = vunpack.i.l.bf16 %v1634_v22  ;;  %1413 = vmatprep.subr.bf16.mxu0 %v1412_v19  ;;  %1439 = vmatpush3.bf16.msra.mxu1 %v1915_v46 }
 0x1ab   : > { %1415 = vmatpush3.bf16.msra.mxu0 %v1885_v29  ;;  %v1440_v25 = vpack.c.bf16 %v1621_v24, %v1620_v26  ;;  %696 = vmatprep.mubr.f32.mxu1 %v1127_v23 }
 0x1ac   : > { %v1416_v30 = vpack.c.bf16 %v1636_v27, %v1635_v28  ;;  %v1629_v32 = vpop.permute.xlu1 %1628 }
 0x1ad   : > { %v1644_v33 = vpop.permute.xlu0 %1643  ;;  %v1631_v35 = vunpack.i.h.bf16 %v1629_v32  ;;  %v1630_v36 = vunpack.i.l.bf16 %v1629_v32  ;;  %1441 = vmatprep.subr.bf16.mxu1 %v1440_v25  ;;  %697 = vmatmul.mubr.f32.gmra.mrb[2].mxu1 %v1126_v31 }
 0x1ae   : > { %v1646_v37 = vunpack.i.h.bf16 %v1644_v33  ;;  %v1645_v38 = vunpack.i.l.bf16 %v1644_v33  ;;  %1417 = vmatprep.subr.bf16.mxu0 %v1416_v30  ;;  %1443 = vmatpush3.bf16.msra.mxu1 %v1930_v55 }
 0x1af   : > { %1419 = vmatpush3.bf16.msra.mxu0 %v1904_v39  ;;  %v1444_v29 = vpack.c.bf16 %v1631_v35, %v1630_v36  ;;  %701 = vmatprep.mubr.f32.mxu1 %v1129_v34 }
 0x1b0   : > { %v1420_v46 = vpack.c.bf16 %v1646_v37, %v1645_v38  ;;  %v1639_v41 = vpop.permute.xlu1 %1638 }
 0x1b1   : > { %v1654_v42 = vpop.permute.xlu0 %1653  ;;  %v1641_v44 = vunpack.i.h.bf16 %v1639_v41  ;;  %v1640_v45 = vunpack.i.l.bf16 %v1639_v41  ;;  %1445 = vmatprep.subr.bf16.mxu1 %v1444_v29  ;;  %702 = vmatmul.mubr.f32.gmra.mrb[4].mxu1 %v1128_v40  ;;  %v1139_v40 = vld [vmem:[%s2144_s4 + $0x98] sm:$0xff] }
 0x1b2   : > { %v1656_v47 = vunpack.i.h.bf16 %v1654_v42  ;;  %v1655_v39 = vunpack.i.l.bf16 %v1654_v42  ;;  %1421 = vmatprep.subr.bf16.mxu0 %v1420_v46  ;;  %1447 = vmatpush3.bf16.msra.mxu1 %v1939_v60  ;;  %v1136_v46 = vld [vmem:[%s2144_s4 + $0x80] sm:$0xff] }
 0x1b3   : > { %v1448_v48 = vpack.c.bf16 %v1641_v44, %v1640_v45  ;;  %706 = vmatprep.mubr.f32.mxu1 %v1131_v43  ;;  %v1138_v45 = vld [vmem:[%s2144_s4 + $0x90] sm:$0xff] }
 0x1b4   : > { %v1422_v55 = vpack.c.bf16 %v1656_v47, %v1655_v39  ;;  %v1649_v50 = vpop.permute.xlu1 %1648  ;;  %v1141_v47 = vld [vmem:[%s2144_s4 + $0xa8] sm:$0xff] }
 0x1b5   : > { %v1664_v51 = vpop.permute.xlu0 %1663  ;;  %v1651_v53 = vunpack.i.h.bf16 %v1649_v50  ;;  %v1650_v54 = vunpack.i.l.bf16 %v1649_v50  ;;  %1449 = vmatprep.subr.bf16.mxu1 %v1448_v48  ;;  %707 = vmatmul.mubr.f32.gmra.mrb[6].mxu1 %v1130_v49  ;;  %v1148_v48 = vld [vmem:[%s2144_s4 + $0xc0] sm:$0xff]  ;;  %v1151_v49 = vld [vmem:[%s2144_s4 + $0xd8] sm:$0xff] }
 0x1b6   : > { %v1666_v56 = vunpack.i.h.bf16 %v1664_v51  ;;  %v1665_v57 = vunpack.i.l.bf16 %v1664_v51  ;;  %1423 = vmatpush3.bf16.msra.mxu0 %v1422_v55  ;;  %1451 = vmatpush3.bf16.msra.mxu1 %v1951_v2  ;;  %v1140_v55 = vld [vmem:[%s2144_s4 + $0xa0] sm:$0xff]  ;;  %v1143_v50 = vld [vmem:[%s2144_s4 + $0xb8] sm:$0xff]  ;;  %v1150_v51 = vld [vmem:[%s2144_s4 + $0xd0] sm:$0xff] }
 0x1b7   : > { %v1452_v58 = vpack.c.bf16 %v1651_v53, %v1650_v54  ;;  %1033 = vmatprep.mubr.f32.mxu1 %v1149_v52  ;;  %v1142_v52 = vld [vmem:[%s2144_s4 + $0xb0] sm:$0xff]  ;;  %v1153_v53 = vld [vmem:[%s2144_s4 + $0xe8] sm:$0xff]  ;;  %v1152_v54 = vld [vmem:[%s2144_s4 + $0xe0] sm:$0xff] }
 0x1b8   : > { %v1424_v60 = vpack.c.bf16 %v1666_v56, %v1665_v57  ;;  %v1659_v59 = vpop.permute.xlu1 %1658  ;;  %v1155_v56 = vld [vmem:[%s2144_s4 + $0xf8] sm:$0xff]  ;;  %v1154_v57 = vld [vmem:[%s2144_s4 + $0xf0] sm:$0xff] }
 0x1b9   : > { %v1674_v61 = vpop.permute.xlu0 %1673  ;;  %v1661_v62 = vunpack.i.h.bf16 %v1659_v59  ;;  %v1660_v63 = vunpack.i.l.bf16 %v1659_v59  ;;  %1453 = vmatprep.subr.bf16.mxu1 %v1452_v58 }
 0x1ba   : > { %v1676_v0 = vunpack.i.h.bf16 %v1674_v61  ;;  %v1675_v1 = vunpack.i.l.bf16 %v1674_v61  ;;  %1425 = vmatprep.subr.bf16.mxu0 %v1424_v60 }
 0x1bb   : > { %v1454_v3 = vpack.c.bf16 %v1661_v62, %v1660_v63 }
 0x1bc   : > { %v1426_v4 = vpack.c.bf16 %v1676_v0, %v1675_v1  ;;  %v1669_v5 = vpop.permute.xlu1 %1668 }
 0x1bd   : > { %v1684_v6 = vpop.permute.xlu0 %1683  ;;  %v1671_v7 = vunpack.i.h.bf16 %v1669_v5  ;;  %v1670_v8 = vunpack.i.l.bf16 %v1669_v5  ;;  %1455 = vmatpush3.bf16.msra.mxu1 %v1454_v3 }
 0x1be   : > { %v1686_v9 = vunpack.i.h.bf16 %v1684_v6  ;;  %v1685_v10 = vunpack.i.l.bf16 %v1684_v6  ;;  %1427 = vmatpush3.bf16.msra.mxu0 %v1426_v4 }
 0x1bf   : > { %v1456_v2 = vpack.c.bf16 %v1671_v7, %v1670_v8 }
 0x1c0   : > { %v1428_v11 = vpack.c.bf16 %v1686_v9, %v1685_v10  ;;  %v1679_v12 = vpop.permute.xlu1 %1678 }
 0x1c1   : > { %v1694_v13 = vpop.permute.xlu0 %1693  ;;  %v1681_v14 = vunpack.i.h.bf16 %v1679_v12  ;;  %v1680_v15 = vunpack.i.l.bf16 %v1679_v12  ;;  %1457 = vmatprep.subr.bf16.mxu1 %v1456_v2 }
 0x1c2   : > { %v1696_v16 = vunpack.i.h.bf16 %v1694_v13  ;;  %v1695_v17 = vunpack.i.l.bf16 %v1694_v13  ;;  %1429 = vmatprep.subr.bf16.mxu0 %v1428_v11 }
 0x1c3   : > { %v1458_v18 = vpack.c.bf16 %v1681_v14, %v1680_v15 }
 0x1c4   : > { %v1430_v19 = vpack.c.bf16 %v1696_v16, %v1695_v17  ;;  %v1689_v20 = vpop.permute.xlu1 %1688 }
 0x1c5   : > { %v1704_v21 = vpop.permute.xlu0 %1703  ;;  %v1691_v22 = vunpack.i.h.bf16 %v1689_v20  ;;  %v1690_v23 = vunpack.i.l.bf16 %v1689_v20  ;;  %1459 = vmatpush3.bf16.msra.mxu1 %v1458_v18 }
 0x1c6   : > { %v1706_v24 = vunpack.i.h.bf16 %v1704_v21  ;;  %v1705_v26 = vunpack.i.l.bf16 %v1704_v21  ;;  %1431 = vmatpush3.bf16.msra.mxu0 %v1430_v19 }
 0x1c7   : > { %v1460_v27 = vpack.c.bf16 %v1691_v22, %v1690_v23 }
 0x1c8   : > { %v1432_v28 = vpack.c.bf16 %v1706_v24, %v1705_v26  ;;  %v1699_v25 = vpop.permute.xlu1 %1698 }
 0x1c9   : > { %v1714_v30 = vpop.permute.xlu0 %1713  ;;  %v1701_v31 = vunpack.i.h.bf16 %v1699_v25  ;;  %v1700_v32 = vunpack.i.l.bf16 %v1699_v25  ;;  %1461 = vmatprep.subr.bf16.mxu1 %v1460_v27 }
 0x1ca   : > { %v1716_v33 = vunpack.i.h.bf16 %v1714_v30  ;;  %v1715_v34 = vunpack.i.l.bf16 %v1714_v30  ;;  %1433 = vmatprep.subr.bf16.mxu0 %v1432_v28 }
 0x1cb   : > { %v1462_v35 = vpack.c.bf16 %v1701_v31, %v1700_v32 }
 0x1cc   : > { %v1434_v36 = vpack.c.bf16 %v1716_v33, %v1715_v34  ;;  %v1709_v37 = vpop.permute.xlu1 %1708 }
 0x1cd   : > { %v1711_v38 = vunpack.i.h.bf16 %v1709_v37  ;;  %v1710_v29 = vunpack.i.l.bf16 %v1709_v37  ;;  %1463 = vmatpush3.bf16.msra.mxu1 %v1462_v35 }
 0x1ce   : > { %1435 = vmatpush3.bf16.msra.mxu0 %v1434_v36 }
 0x1cf   : > { %v1464_v41 = vpack.c.bf16 %v1711_v38, %v1710_v29 }
 0x1d0   : > { %v1719_v42 = vpop.permute.xlu1 %1718 }
 0x1d1   : > { %863 = vmatmul.mubr.f32.vlgmr.msra.gmra.mrb[8].mxu0 %v1136_v46  ;;  %v1721_v43 = vunpack.i.h.bf16 %v1719_v42  ;;  %v1720_v44 = vunpack.i.l.bf16 %v1719_v42  ;;  %1465 = vmatprep.subr.bf16.mxu1 %v1464_v41 }
 0x1d2   : > { %867 = vmatprep.mubr.f32.mxu0 %v1139_v40 }
 0x1d3   : > { %v1466_v39 = vpack.c.bf16 %v1721_v43, %v1720_v44 }
 0x1d5   : > { %868 = vmatmul.mubr.f32.gmra.mrb[10].mxu0 %v1138_v45  ;;  %1467 = vmatpush3.bf16.msra.mxu1 %v1466_v39 }
 0x1d6   : > { %872 = vmatprep.mubr.f32.mxu0 %v1141_v47 }
 0x1d8   : > { %1034 = vmatmul.mubr.f32.vlgmr.msra.gmra.mrb[8].mxu1 %v1148_v48 }
 0x1d9   : > { %873 = vmatmul.mubr.f32.gmra.mrb[12].mxu0 %v1140_v55  ;;  %1038 = vmatprep.mubr.f32.mxu1 %v1151_v49 }
 0x1da   : > { %877 = vmatprep.mubr.f32.mxu0 %v1143_v50 }
 0x1dc   : > { %1039 = vmatmul.mubr.f32.gmra.mrb[10].mxu1 %v1150_v51 }
 0x1dd   : > { %878 = vmatmul.mubr.f32.gmra.mrb[14].mxu0 %v1142_v52  ;;  %1043 = vmatprep.mubr.f32.mxu1 %v1153_v53 }
 0x1e0   : > { %1044 = vmatmul.mubr.f32.gmra.mrb[12].mxu1 %v1152_v54 }
 0x1e1   : > { %1048 = vmatprep.mubr.f32.mxu1 %v1155_v56 }
 0x1e4   : > { %1049 = vmatmul.mubr.f32.gmra.mrb[14].mxu1 %v1154_v57 }
 0x209   : > { %v1196_v58 = vpop.f32.mrb[0].mxu0 }
 0x20a   : > { %v1197_v60 = vpop.f32.mrb[1].mxu0 }
 0x20b   : > { %v1198_v59 = vadd.f32 %v1197_v60, %v1196_v58 }
 0x20d   : > { %542 = vst.msk [vmem:[%s2103_s11] sm:$0xff] %vm541_vm0, %v1198_v59  ;;  %v1199_v61 = vpop.f32.mrb[2].mxu0 }
 0x20e   : > { %v1200_v62 = vpop.f32.mrb[3].mxu0 }
 0x20f   : > { %v1201_v63 = vadd.f32 %v1200_v62, %v1199_v61 }
 0x211   : > { %543 = vst.msk [vmem:[%s2103_s11 + $0x8] sm:$0xff] %vm541_vm0, %v1201_v63  ;;  %v1202_v0 = vpop.f32.mrb[4].mxu0 }
 0x212   : > { %v1203_v1 = vpop.f32.mrb[5].mxu0 }
 0x213   : > { %v1204_v3 = vadd.f32 %v1203_v1, %v1202_v0 }
 0x215   : > { %544 = vst.msk [vmem:[%s2103_s11 + $0x10] sm:$0xff] %vm541_vm0, %v1204_v3  ;;  %v1205_v4 = vpop.f32.mrb[6].mxu0 }
 0x216   : > { %v1206_v5 = vpop.f32.mrb[7].mxu0 }
 0x217   : > { %v1207_v6 = vadd.f32 %v1206_v5, %v1205_v4 }
 0x219   : > { %545 = vst.msk [vmem:[%s2103_s11 + $0x18] sm:$0xff] %vm541_vm0, %v1207_v6 }
 0x27c   : > { %v1240_v7 = vpop.f32.mrb[0].mxu1 }
 0x27d   : > { %v1241_v8 = vpop.f32.mrb[1].mxu1 }
 0x27e   : > { %v1242_v9 = vadd.f32 %v1241_v8, %v1240_v7 }
 0x280   : > { %1132 = vst.msk [vmem:[%s2103_s11 + $0x20] sm:$0xff] %vm541_vm0, %v1242_v9  ;;  %v1243_v10 = vpop.f32.mrb[2].mxu1 }
 0x281   : > { %v1244_v2 = vpop.f32.mrb[3].mxu1 }
 0x282   : > { %v1245_v11 = vadd.f32 %v1244_v2, %v1243_v10 }
 0x284   : > { %1133 = vst.msk [vmem:[%s2103_s11 + $0x28] sm:$0xff] %vm541_vm0, %v1245_v11  ;;  %v1246_v12 = vpop.f32.mrb[4].mxu1 }
 0x285   : > { %v1247_v13 = vpop.f32.mrb[5].mxu1 }
 0x286   : > { %v1248_v14 = vadd.f32 %v1247_v13, %v1246_v12 }
 0x288   : > { %1134 = vst.msk [vmem:[%s2103_s11 + $0x30] sm:$0xff] %vm541_vm0, %v1248_v14  ;;  %v1249_v15 = vpop.f32.mrb[6].mxu1 }
 0x289   : > { %v1250_v16 = vpop.f32.mrb[7].mxu1 }
 0x28a   : > { %v1251_v17 = vadd.f32 %v1250_v16, %v1249_v15 }
 0x28c   : > { %1135 = vst.msk [vmem:[%s2103_s11 + $0x38] sm:$0xff] %vm541_vm0, %v1251_v17 }
 0x2a4   : > { %v1284_v18 = vpop.f32.mrb[8].mxu0 }
 0x2a5   : > { %v1285_v19 = vpop.f32.mrb[9].mxu0 }
 0x2a6   : > { %v1286_v20 = vadd.f32 %v1285_v19, %v1284_v18 }
 0x2a8   : > { %1144 = vst.msk [vmem:[%s2103_s11 + $0x40] sm:$0xff] %vm541_vm0, %v1286_v20  ;;  %v1287_v21 = vpop.f32.mrb[10].mxu0 }
 0x2a9   : > { %v1288_v22 = vpop.f32.mrb[11].mxu0 }
 0x2aa   : > { %v1289_v23 = vadd.f32 %v1288_v22, %v1287_v21 }
 0x2ab   : > { %v1328_v24 = vpop.f32.mrb[8].mxu1 }
 0x2ac   : > { %1145 = vst.msk [vmem:[%s2103_s11 + $0x48] sm:$0xff] %vm541_vm0, %v1289_v23  ;;  %v1290_v26 = vpop.f32.mrb[12].mxu0  ;;  %v1329_v27 = vpop.f32.mrb[9].mxu1 }
 0x2ad   : > { %v1291_v28 = vpop.f32.mrb[13].mxu0  ;;  %v1330_v25 = vadd.f32 %v1329_v27, %v1328_v24 }
 0x2ae   : > { %v1292_v30 = vadd.f32 %v1291_v28, %v1290_v26 }
 0x2af   : > { %1156 = vst.msk [vmem:[%s2103_s11 + $0x60] sm:$0xff] %vm541_vm0, %v1330_v25  ;;  %v1331_v31 = vpop.f32.mrb[10].mxu1 }
 0x2b0   : > { %1146 = vst.msk [vmem:[%s2103_s11 + $0x50] sm:$0xff] %vm541_vm0, %v1292_v30  ;;  %v1293_v32 = vpop.f32.mrb[14].mxu0  ;;  %v1332_v33 = vpop.f32.mrb[11].mxu1 }
 0x2b1   : > { %v1294_v34 = vpop.f32.mrb[15].mxu0  ;;  %v1333_v35 = vadd.f32 %v1332_v33, %v1331_v31 }
 0x2b2   : > { %v1295_v36 = vadd.f32 %v1294_v34, %v1293_v32 }
 0x2b3   : > { %1157 = vst.msk [vmem:[%s2103_s11 + $0x68] sm:$0xff] %vm541_vm0, %v1333_v35  ;;  %v1334_v37 = vpop.f32.mrb[12].mxu1 }
 0x2b4   : > { %1147 = vst.msk [vmem:[%s2103_s11 + $0x58] sm:$0xff] %vm541_vm0, %v1295_v36  ;;  %v1335_v38 = vpop.f32.mrb[13].mxu1 }
 0x2b5   : > { %v1336_v29 = vadd.f32 %v1335_v38, %v1334_v37 }
 0x2b7   : > { %1158 = vst.msk [vmem:[%s2103_s11 + $0x70] sm:$0xff] %vm541_vm0, %v1336_v29  ;;  %v1337_v46 = vpop.f32.mrb[14].mxu1 }
 0x2b8   : > { %v1338_v40 = vpop.f32.mrb[15].mxu1 }
 0x2b9   : > { %v1339_v41 = vadd.f32 %v1338_v40, %v1337_v46 }
 0x2bb   : > { %1159 = vst.msk [vmem:[%s2103_s11 + $0x78] sm:$0xff] %vm541_vm0, %v1339_v41 }
 0x2bc PF: > { %s15_s18 = sadd.s32 1, %s1728_s18  }
 0x2bd   : > { %p12_p4 = scmp.ge.s32.totalorder %s15_s18, 4  }
 0x2bf   :  { %14 = sbr.rel (!%p12_p4) target bundleno = 1 (0x1), region = 76 }

// kernel: generator32_forward.6
= control target key start
LH: loop header
LB: loop body
LE: loop exit
PB: predicated region body
PF: predicated region fallthrough
CT: control target
= control target key end

     0   :  { %s1368_s18 = smov 0   ;;  %s1484_s0 = inlined_call_operand.vmem [shape: f32[2,32,102], index: 0, kind: input, shape index: {}]   ;;  %s1485_s1 = inlined_call_operand.vmem [shape: f32[32,1], index: 1, kind: input, shape index: {}]   ;;  %s1486_s2 = inlined_call_operand.vmem [shape: f32[32,1], index: 2, kind: input, shape index: {}]   ;;  %s1487_s3 = inlined_call_operand.vmem [shape: f32[1,102], index: 3, kind: input, shape index: {}]   ;;  %s1488_s4 = inlined_call_operand.vmem [shape: f32[4,16,128], index: 4, kind: input, shape index: {}]   ;;  %s1489_s5 = inlined_call_operand.vmem [shape: f32[2,4,16,80], index: 5, kind: output, shape index: {}]  }
   0x1 LB: > { %s826_s19 = sadd.s32 4294967295, %s1332_s18   ;;  %p830_p0 = scmp.ge.s32.totalorder %s1332_s18, 1  ;;  %s1332_s18 = sphi %s1368_s18, %s15_s18  }
   0x2   : > { %p187_p1 = scmp.lt.s32.totalorder %s1332_s18, 3 }
   0x4   : > { %p188_p2 = pnand %p830_p0, %p187_p1 }
   0x5   : > { %v257_v0 = vld [vmem:[%s1486_s2] sm:$0xff] (!%p188_p2)  ;;  %v1334_v2 = vmov (!%p188_p2), 0   ;;  %v258_v3 = vld [vmem:[%s1486_s2 + $0x8] sm:$0xff] (!%p188_p2)  ;;  %v232_v5 = vld [vmem:[%s1485_s1 + $0x18] sm:$0xff] (!%p188_p2)  ;;  %p215_p3 = scmp.lt.s32.totalorder (!%p188_p2), %s826_s19, 1  ;;  %s1335_s17 = smov (!%p188_p2), 127  }
   0x6   : > { %191 = sbr.rel (%p188_p2) target bundleno = 655 (0x28f), region = 40  ;;  %v229_v1 = vld [vmem:[%s1485_s1] sm:$0xff] (!%p188_p2)  ;;  %1205 = vset.pattern.permute.xlu1 (!%p188_p2), %v1334_v2  ;;  %1204 = vset.pattern.permute.xlu0 (!%p188_p2), %v1334_v2  ;;  %v230_v4 = vld [vmem:[%s1485_s1 + $0x8] sm:$0xff] (!%p188_p2)  ;;  %v231_v6 = vld [vmem:[%s1485_s1 + $0x10] sm:$0xff] (!%p188_p2)  ;;  %s1336_s20 = smov (!%p188_p2), 118   ;;  %vm417_vm0 = vcmask (!%p188_p2), 654336  }
   0x7   : > { %263 = vperm.xlu1 (!%p188_p2), %1205, %v257_v0   ;;  %235 = vperm.xlu0 (!%p188_p2), %1204, %v229_v1   ;;  %v260_v7 = vld [vmem:[%s1486_s2 + $0x18] sm:$0xff] (!%p188_p2)  ;;  %v259_v8 = vld [vmem:[%s1486_s2 + $0x10] sm:$0xff] (!%p188_p2)  ;;  %v835_v20 = vld [vmem:[%s1487_s3] ss:$0 sm:$0xff] (!%p188_p2)  ;;  %s1337_s21 = smov (!%p188_p2), 117  }
   0x8   : > { %v340_v42 = vld [vmem:[%s1488_s4] sm:$0xff] (!%p188_p2)  ;;  %v836_v2 = vld [vmem:[%s1488_s4 + $0x10] sm:$0xff] (!%p188_p2) }
   0x9   : > { %956 = vmatprep.mubr.f32.mxu0 (!%p188_p2), %v340_v42  ;;  %991 = vmatprep.mubr.f32.mxu1 (!%p188_p2), %v836_v2 }
   0xb   : > { %268 = vperm.xlu1 (!%p188_p2), %1205, %v258_v3   ;;  %240 = vperm.xlu0 (!%p188_p2), %1204, %v230_v4   ;;  %v341_v4 = vld [vmem:[%s1488_s4 + $0x8] sm:$0xff] (!%p188_p2) }
   0xd   : > { %s1491_s19 = smov (!%p215_p3, %s826_s19), 1 }
   0xe   : > { %s850_s11 = sshll.u32 %s1491_s19, 5  ;;  %s851_s13 = sshll.u32 %s1491_s19, 6 }
   0xf   : > { %250 = vperm.xlu1 %1205, %v232_v5   ;;  %245 = vperm.xlu0 %1204, %v231_v6   ;;  %s219_s14 = scalar_lea.vmem %s1484_s0, %s850_s11  ;;  %v840_v5 = vld [vmem:[%s1488_s4 + $0x20] sm:$0xff]  ;;  %s224_s16 = scalar_lea.vmem %s1489_s5, %s851_s13 }
  0x10   : > { %v225_v9 = vld [vmem:[%s219_s14] sm:$0xff]  ;;  %v226_v13 = vld [vmem:[%s219_s14 + $0x8] sm:$0xff]  ;;  %v228_v22 = vld [vmem:[%s219_s14 + $0x18] sm:$0xff] }
  0x11   : > { %v227_v24 = vld [vmem:[%s219_s14 + $0x10] sm:$0xff] }
  0x13   : > { %278 = vperm.xlu1 %1205, %v260_v7   ;;  %273 = vperm.xlu0 %1204, %v259_v8  }
  0x86   : > { %v264_v10 = vpop.permute.xlu1 %263  ;;  %v236_v11 = vpop.permute.xlu0 %235 }
  0x87   : > { %v253_v12 = vmul.f32 %v236_v11, %v225_v9 }
  0x89   : > { %v281_v14 = vadd.f32 %v264_v10, %v253_v12 }
  0x8a   : > { %v269_v15 = vpop.permute.xlu1 %268  ;;  %v241_v16 = vpop.permute.xlu0 %240 }
  0x8b   : > { %v254_v17 = vmul.f32 %v241_v16, %v226_v13  ;;  %v285_v18 = vmax.f32 %v281_v14, 0.0 }
  0x8d   : > { %v282_v19 = vadd.f32 %v269_v15, %v254_v17  ;;  %v296_v26 = vmul.f32 %v835_v20, %v285_v18 }
  0x8e   : > { %v251_v21 = vpop.permute.xlu1 %250  ;;  %v246_v23 = vpop.permute.xlu0 %245 }
  0x8f   : > { %v286_v25 = vmax.f32 %v282_v19, 0.0  ;;  %v256_v28 = vmul.f32 %v251_v21, %v228_v22  ;;  %v255_v29 = vmul.f32 %v246_v23, %v227_v24 }
  0x91   : > { %v297_v27 = vmul.f32 %v835_v20, %v286_v25 }
  0x92   : > { %v279_v30 = vpop.permute.xlu1 %278  ;;  %v274_v31 = vpop.permute.xlu0 %273 }
  0x93   : > { %v284_v32 = vadd.f32 %v279_v30, %v256_v28  ;;  %v283_v33 = vadd.f32 %v274_v31, %v255_v29  ;;  %v1206_v34 = vpack.i.bf16 %v297_v27, %v296_v26  ;;  %v1064_v35 = vpack.c.bf16 %v297_v27, %v296_v26 }
  0x95   : > { %v288_v36 = vmax.f32 %v284_v32, 0.0  ;;  %v287_v37 = vmax.f32 %v283_v33, 0.0  ;;  %1207 = vrot.lane.b32.xlu0 %v1206_v34, %s1335_s17  ;;  %1065 = vmatprep.subr.bf16.mxu0 %v1064_v35 }
  0x96   : > { %1067 = vmatpush3.bf16.msra.mxu0 %v1064_v35 }
  0x97   : > { %v299_v38 = vmul.f32 %v835_v20, %v288_v36  ;;  %v298_v39 = vmul.f32 %v835_v20, %v287_v37 }
  0x99   : > { %1217 = vrot.lane.b32.xlu0 %v1206_v34, %s1336_s20  ;;  %v1211_v40 = vpack.i.bf16 %v299_v38, %v298_v39  ;;  %v1068_v41 = vpack.c.bf16 %v299_v38, %v298_v39 }
  0x9b   : > { %1212 = vrot.lane.b32.xlu1 %v1211_v40, %s1335_s17  ;;  %1069 = vmatprep.subr.bf16.mxu0 %v1068_v41 }
  0x9c   : > { %1071 = vmatpush3.bf16.msra.mxu0 %v1068_v41 }
  0x9d   : > { %1227 = vrot.lane.b32.xlu0 %v1206_v34, %s1337_s21 }
  0x9f   : > { %1222 = vrot.lane.b32.xlu1 %v1211_v40, %s1336_s20 }
  0xa3   : > { %1232 = vrot.lane.b32.xlu1 %v1211_v40, %s1337_s21 }
 0x107   : > { %v1208_v43 = vpop.permute.xlu0 %1207 }
 0x108   : > { %v1210_v44 = vunpack.i.h.bf16 %v1208_v43  ;;  %v1209_v45 = vunpack.i.l.bf16 %v1208_v43  ;;  %1237 = vrot.lane.b32.xlu0 %v1208_v43, %s1335_s17 }
 0x10a   : > { %v1072_v46 = vpack.c.bf16 %v1210_v44, %v1209_v45 }
 0x10b   : > { %v1218_v47 = vpop.permute.xlu0 %1217 }
 0x10c   : > { %v1220_v48 = vunpack.i.h.bf16 %v1218_v47  ;;  %v1219_v49 = vunpack.i.l.bf16 %v1218_v47  ;;  %1097 = vmatprep.subr.bf16.mxu1 %v1072_v46  ;;  %1073 = vmatprep.subr.bf16.mxu0 %v1072_v46 }
 0x10d   : > { %v1213_v50 = vpop.permute.xlu1 %1212  ;;  %1099 = vmatpush3.bf16.msra.mxu1 %v1072_v46  ;;  %1075 = vmatpush3.bf16.msra.mxu0 %v1072_v46 }
 0x10e   : > { %v1215_v51 = vunpack.i.h.bf16 %v1213_v50  ;;  %v1214_v52 = vunpack.i.l.bf16 %v1213_v50  ;;  %1247 = vrot.lane.b32.xlu0 %v1218_v47, %s1335_s17  ;;  %1242 = vrot.lane.b32.xlu1 %v1213_v50, %s1335_s17  ;;  %v1080_v60 = vpack.c.bf16 %v1220_v48, %v1219_v49  ;;  %v837_v49 = vld [vmem:[%s1488_s4 + $0x18] sm:$0xff] }
 0x10f   : > { %v1228_v53 = vpop.permute.xlu0 %1227 }
 0x110   : > { %v1230_v54 = vunpack.i.h.bf16 %v1228_v53  ;;  %v1229_v55 = vunpack.i.l.bf16 %v1228_v53  ;;  %v1076_v56 = vpack.c.bf16 %v1215_v51, %v1214_v52  ;;  %v844_v52 = vld [vmem:[%s1488_s4 + $0x30] sm:$0xff] }
 0x111   : > { %v1223_v57 = vpop.permute.xlu1 %1222 }
 0x112   : > { %v1225_v58 = vunpack.i.h.bf16 %v1223_v57  ;;  %v1224_v59 = vunpack.i.l.bf16 %v1223_v57  ;;  %1077 = vmatprep.subr.bf16.mxu0 %v1076_v56  ;;  %1101 = vmatprep.subr.bf16.mxu1 %v1076_v56  ;;  %v1425_v1 = vpack.c.bf16 %v1230_v54, %v1229_v55 }
 0x113   : > { %1079 = vmatpush3.bf16.msra.mxu0 %v1076_v56  ;;  %1103 = vmatpush3.bf16.msra.mxu1 %v1076_v56 }
 0x114   : > { %1257 = vrot.lane.b32.xlu0 %v1228_v53, %s1335_s17  ;;  %1081 = vmatprep.subr.bf16.mxu0 %v1080_v60  ;;  %v1084_v0 = vpack.c.bf16 %v1225_v58, %v1224_v59 }
 0x115   : > { %v1233_v61 = vpop.permute.xlu1 %1232  ;;  %1252 = vrot.lane.b32.xlu1 %v1223_v57, %s1335_s17 }
 0x116   : > { %v1235_v62 = vunpack.i.h.bf16 %v1233_v61  ;;  %v1234_v63 = vunpack.i.l.bf16 %v1233_v61 }
 0x117   : > { %1083 = vmatpush3.bf16.msra.mxu0 %v1080_v60 }
 0x118   : > { %1267 = vrot.lane.b32.xlu0 %v1208_v43, %s1336_s20  ;;  %1085 = vmatprep.subr.bf16.mxu0 %v1084_v0  ;;  %v1433_v3 = vpack.c.bf16 %v1235_v62, %v1234_v63 }
 0x119   : > { %1262 = vrot.lane.b32.xlu1 %v1233_v61, %s1335_s17 }
 0x11b   : > { %1087 = vmatpush3.bf16.msra.mxu0 %v1084_v0 }
 0x11c   : > { %1277 = vrot.lane.b32.xlu0 %v1213_v50, %s1336_s20  ;;  %1089 = vmatprep.subr.bf16.mxu0 %v1425_v1 }
 0x11d   : > { %1272 = vrot.lane.b32.xlu1 %v1208_v43, %s1337_s21 }
 0x11f   : > { %1091 = vmatpush3.bf16.msra.mxu0 %v1425_v1 }
 0x120   : > { %1287 = vrot.lane.b32.xlu0 %v1218_v47, %s1336_s20  ;;  %1093 = vmatprep.subr.bf16.mxu0 %v1433_v3 }
 0x121   : > { %1282 = vrot.lane.b32.xlu1 %v1213_v50, %s1337_s21 }
 0x123   : > { %1095 = vmatpush3.bf16.msra.mxu0 %v1433_v3 }
 0x124   : > { %1297 = vrot.lane.b32.xlu0 %v1223_v57, %s1336_s20  ;;  %1129 = vmatprep.subr.bf16.mxu0 %v1080_v60 }
 0x125   : > { %1292 = vrot.lane.b32.xlu1 %v1218_v47, %s1337_s21 }
 0x126   : > { %957 = vmatmul.mubr.f32.vlgmr.msra.gmra.mrb[0].mxu0 %v341_v4 }
 0x127   : > { %1131 = vmatpush3.bf16.msra.mxu0 %v1080_v60  ;;  %1026 = vmatprep.mubr.f32.mxu0 %v840_v5 }
 0x128   : > { %1307 = vrot.lane.b32.xlu0 %v1228_v53, %s1336_s20  ;;  %1133 = vmatprep.subr.bf16.mxu0 %v1084_v0 }
 0x129   : > { %1302 = vrot.lane.b32.xlu1 %v1223_v57, %s1337_s21 }
 0x12b   : > { %1135 = vmatpush3.bf16.msra.mxu0 %v1084_v0 }
 0x12c   : > { %1317 = vrot.lane.b32.xlu0 %v1233_v61, %s1336_s20 }
 0x12d   : > { %1312 = vrot.lane.b32.xlu1 %v1228_v53, %s1337_s21 }
 0x131   : > { %1322 = vrot.lane.b32.xlu1 %v1233_v61, %s1337_s21 }
 0x17a   : > { %v1238_v6 = vpop.permute.xlu0 %1237 }
 0x17b   : > { %v1240_v7 = vunpack.i.h.bf16 %v1238_v6  ;;  %v1239_v8 = vunpack.i.l.bf16 %v1238_v6 }
 0x17d   : > { %v1104_v9 = vpack.c.bf16 %v1240_v7, %v1239_v8 }
 0x17f   : > { %1105 = vmatprep.subr.bf16.mxu1 %v1104_v9 }
 0x180   : > { %v1248_v10 = vpop.permute.xlu0 %1247  ;;  %v1243_v11 = vpop.permute.xlu1 %1242  ;;  %1107 = vmatpush3.bf16.msra.mxu1 %v1104_v9 }
 0x181   : > { %v1250_v12 = vunpack.i.h.bf16 %v1248_v10  ;;  %v1249_v13 = vunpack.i.l.bf16 %v1248_v10  ;;  %v1245_v14 = vunpack.i.h.bf16 %v1243_v11  ;;  %v1244_v15 = vunpack.i.l.bf16 %v1243_v11 }
 0x183   : > { %v1108_v17 = vpack.c.bf16 %v1245_v14, %v1244_v15  ;;  %v1112_v19 = vpack.c.bf16 %v1250_v12, %v1249_v13 }
 0x185   : > { %1109 = vmatprep.subr.bf16.mxu1 %v1108_v17 }
 0x186   : > { %v1258_v16 = vpop.permute.xlu0 %1257  ;;  %1111 = vmatpush3.bf16.msra.mxu1 %v1108_v17  ;;  %v845_v17 = vld [vmem:[%s1488_s4 + $0x38] sm:$0xff] }
 0x187   : > { %v1253_v18 = vpop.permute.xlu1 %1252  ;;  %1113 = vmatprep.subr.bf16.mxu1 %v1112_v19  ;;  %v1260_v26 = vunpack.i.h.bf16 %v1258_v16  ;;  %v1259_v27 = vunpack.i.l.bf16 %v1258_v16 }
 0x188   : > { %v1255_v20 = vunpack.i.h.bf16 %v1253_v18  ;;  %v1254_v21 = vunpack.i.l.bf16 %v1253_v18 }
 0x189   : > { %v1120_v34 = vpack.c.bf16 %v1260_v26, %v1259_v27 }
 0x18a   : > { %v1268_v22 = vpop.permute.xlu0 %1267  ;;  %v1116_v28 = vpack.c.bf16 %v1255_v20, %v1254_v21  ;;  %1115 = vmatpush3.bf16.msra.mxu1 %v1112_v19 }
 0x18b   : > { %v1270_v23 = vunpack.i.h.bf16 %v1268_v22  ;;  %v1269_v24 = vunpack.i.l.bf16 %v1268_v22  ;;  %v1263_v25 = vpop.permute.xlu1 %1262 }
 0x18c   : > { %1117 = vmatprep.subr.bf16.mxu1 %v1116_v28  ;;  %v1265_v35 = vunpack.i.h.bf16 %v1263_v25  ;;  %v1264_v36 = vunpack.i.l.bf16 %v1263_v25 }
 0x18d   : > { %v1136_v29 = vpack.c.bf16 %v1270_v23, %v1269_v24 }
 0x18e   : > { %v1278_v30 = vpop.permute.xlu0 %1277  ;;  %1119 = vmatpush3.bf16.msra.mxu1 %v1116_v28  ;;  %v1124_v41 = vpack.c.bf16 %v1265_v35, %v1264_v36 }
 0x18f   : > { %v1280_v31 = vunpack.i.h.bf16 %v1278_v30  ;;  %v1279_v32 = vunpack.i.l.bf16 %v1278_v30  ;;  %1137 = vmatprep.subr.bf16.mxu0 %v1136_v29  ;;  %v1273_v33 = vpop.permute.xlu1 %1272  ;;  %1121 = vmatprep.subr.bf16.mxu1 %v1120_v34 }
 0x190   : > { %1139 = vmatpush3.bf16.msra.mxu0 %v1136_v29  ;;  %v1275_v54 = vunpack.i.h.bf16 %v1273_v33  ;;  %v1274_v55 = vunpack.i.l.bf16 %v1273_v33 }
 0x191   : > { %v1140_v37 = vpack.c.bf16 %v1280_v31, %v1279_v32 }
 0x192   : > { %v1288_v38 = vpop.permute.xlu0 %1287  ;;  %1123 = vmatpush3.bf16.msra.mxu1 %v1120_v34  ;;  %v1168_v60 = vpack.c.bf16 %v1275_v54, %v1274_v55 }
 0x193   : > { %v1290_v39 = vunpack.i.h.bf16 %v1288_v38  ;;  %v1289_v40 = vunpack.i.l.bf16 %v1288_v38  ;;  %1141 = vmatprep.subr.bf16.mxu0 %v1140_v37  ;;  %v1283_v43 = vpop.permute.xlu1 %1282  ;;  %1125 = vmatprep.subr.bf16.mxu1 %v1124_v41 }
 0x194   : > { %1143 = vmatpush3.bf16.msra.mxu0 %v1140_v37  ;;  %v1285_v61 = vunpack.i.h.bf16 %v1283_v43  ;;  %v1284_v62 = vunpack.i.l.bf16 %v1283_v43 }
 0x195   : > { %v1144_v42 = vpack.c.bf16 %v1290_v39, %v1289_v40 }
 0x196   : > { %v1298_v44 = vpop.permute.xlu0 %1297  ;;  %1127 = vmatpush3.bf16.msra.mxu1 %v1124_v41  ;;  %v1172_v2 = vpack.c.bf16 %v1285_v61, %v1284_v62 }
 0x197   : > { %v1300_v45 = vunpack.i.h.bf16 %v1298_v44  ;;  %v1299_v46 = vunpack.i.l.bf16 %v1298_v44  ;;  %1145 = vmatprep.subr.bf16.mxu0 %v1144_v42  ;;  %1161 = vmatprep.subr.bf16.mxu1 %v1425_v1  ;;  %v1293_v53 = vpop.permute.xlu1 %1292 }
 0x198   : > { %1147 = vmatpush3.bf16.msra.mxu0 %v1144_v42  ;;  %v1295_v4 = vunpack.i.h.bf16 %v1293_v53  ;;  %v1294_v5 = vunpack.i.l.bf16 %v1293_v53 }
 0x199   : > { %v1148_v47 = vpack.c.bf16 %v1300_v45, %v1299_v46  ;;  %992 = vmatmul.mubr.f32.vlgmr.msra.gmra.mrb[0].mxu1 %v837_v49 }
 0x19a   : > { %v1308_v48 = vpop.permute.xlu0 %1307  ;;  %1163 = vmatpush3.bf16.msra.mxu1 %v1425_v1  ;;  %1061 = vmatprep.mubr.f32.mxu1 %v844_v52  ;;  %v841_v1 = vld [vmem:[%s1488_s4 + $0x28] sm:$0xff]  ;;  %v1176_v7 = vpack.c.bf16 %v1295_v4, %v1294_v5 }
 0x19b   : > { %v1310_v50 = vunpack.i.h.bf16 %v1308_v48  ;;  %v1309_v51 = vunpack.i.l.bf16 %v1308_v48  ;;  %1149 = vmatprep.subr.bf16.mxu0 %v1148_v47  ;;  %1165 = vmatprep.subr.bf16.mxu1 %v1433_v3  ;;  %v1303_v0 = vpop.permute.xlu1 %1302 }
 0x19c   : > { %1151 = vmatpush3.bf16.msra.mxu0 %v1148_v47  ;;  %v1305_v8 = vunpack.i.h.bf16 %v1303_v0  ;;  %v1304_v9 = vunpack.i.l.bf16 %v1303_v0 }
 0x19d   : > { %v1152_v56 = vpack.c.bf16 %v1310_v50, %v1309_v51 }
 0x19e   : > { %v1318_v57 = vpop.permute.xlu0 %1317  ;;  %1167 = vmatpush3.bf16.msra.mxu1 %v1433_v3  ;;  %v1180_v3 = vpack.c.bf16 %v1305_v8, %v1304_v9 }
 0x19f   : > { %v1320_v58 = vunpack.i.h.bf16 %v1318_v57  ;;  %v1319_v59 = vunpack.i.l.bf16 %v1318_v57  ;;  %1153 = vmatprep.subr.bf16.mxu0 %v1152_v56  ;;  %1169 = vmatprep.subr.bf16.mxu1 %v1168_v60  ;;  %v1313_v6 = vpop.permute.xlu1 %1312 }
 0x1a0   : > { %1155 = vmatpush3.bf16.msra.mxu0 %v1152_v56  ;;  %v1315_v10 = vunpack.i.h.bf16 %v1313_v6  ;;  %v1314_v11 = vunpack.i.l.bf16 %v1313_v6 }
 0x1a1   : > { %v1156_v63 = vpack.c.bf16 %v1320_v58, %v1319_v59 }
 0x1a2   : > { %1171 = vmatpush3.bf16.msra.mxu1 %v1168_v60  ;;  %v1184_v13 = vpack.c.bf16 %v1315_v10, %v1314_v11 }
 0x1a3   : > { %1157 = vmatprep.subr.bf16.mxu0 %v1156_v63  ;;  %1173 = vmatprep.subr.bf16.mxu1 %v1172_v2  ;;  %v1323_v12 = vpop.permute.xlu1 %1322 }
 0x1a4   : > { %1159 = vmatpush3.bf16.msra.mxu0 %v1156_v63  ;;  %v1325_v14 = vunpack.i.h.bf16 %v1323_v12  ;;  %v1324_v15 = vunpack.i.l.bf16 %v1323_v12 }
 0x1a6   : > { %1175 = vmatpush3.bf16.msra.mxu1 %v1172_v2  ;;  %v1188_v16 = vpack.c.bf16 %v1325_v14, %v1324_v15 }
 0x1a7   : > { %1027 = vmatmul.mubr.f32.vlgmr.msra.gmra.mrb[2].mxu0 %v841_v1  ;;  %1177 = vmatprep.subr.bf16.mxu1 %v1176_v7 }
 0x1aa   : > { %1179 = vmatpush3.bf16.msra.mxu1 %v1176_v7 }
 0x1ab   : > { %1181 = vmatprep.subr.bf16.mxu1 %v1180_v3 }
 0x1ae   : > { %1183 = vmatpush3.bf16.msra.mxu1 %v1180_v3 }
 0x1af   : > { %1185 = vmatprep.subr.bf16.mxu1 %v1184_v13 }
 0x1b2   : > { %1187 = vmatpush3.bf16.msra.mxu1 %v1184_v13 }
 0x1b3   : > { %1189 = vmatprep.subr.bf16.mxu1 %v1188_v16 }
 0x1b6   : > { %1191 = vmatpush3.bf16.msra.mxu1 %v1188_v16 }
 0x1b9   : > { %1062 = vmatmul.mubr.f32.vlgmr.msra.gmra.mrb[2].mxu1 %v845_v17 }
 0x1f9   : > { %v958_v18 = vpop.f32.mrb[0].mxu0 }
 0x1fa   : > { %419 = vst.msk [vmem:[%s224_s16 + $0x8] sm:$0xff] %vm417_vm0, %v958_v18  ;;  %v408_v19 = vpop.f32.mrb[1].mxu0 }
 0x1fb   : > { %418 = vst.msk [vmem:[%s224_s16] sm:$0xff] %vm417_vm0, %v408_v19 }
 0x26c   : > { %v993_v20 = vpop.f32.mrb[0].mxu1 }
 0x26d   : > { %839 = vst.msk [vmem:[%s224_s16 + $0x18] sm:$0xff] %vm417_vm0, %v993_v20  ;;  %v525_v21 = vpop.f32.mrb[1].mxu1 }
 0x26e   : > { %838 = vst.msk [vmem:[%s224_s16 + $0x10] sm:$0xff] %vm417_vm0, %v525_v21 }
 0x27a   : > { %v1028_v22 = vpop.f32.mrb[2].mxu0 }
 0x27b   : > { %843 = vst.msk [vmem:[%s224_s16 + $0x28] sm:$0xff] %vm417_vm0, %v1028_v22  ;;  %v642_v23 = vpop.f32.mrb[3].mxu0 }
 0x27c   : > { %842 = vst.msk [vmem:[%s224_s16 + $0x20] sm:$0xff] %vm417_vm0, %v642_v23 }
 0x28c   : > { %v1063_v24 = vpop.f32.mrb[2].mxu1 }
 0x28d   : > { %847 = vst.msk [vmem:[%s224_s16 + $0x38] sm:$0xff] %vm417_vm0, %v1063_v24  ;;  %v759_v25 = vpop.f32.mrb[3].mxu1 }
 0x28e   : > { %846 = vst.msk [vmem:[%s224_s16 + $0x30] sm:$0xff] %vm417_vm0, %v759_v25 }
 0x28f PF: > { %s15_s18 = sadd.s32 1, %s1332_s18  }
 0x290   : > { %p12_p4 = scmp.ge.s32.totalorder %s15_s18, 4  }
 0x292   :  { %14 = sbr.rel (!%p12_p4) target bundleno = 1 (0x1), region = 76 }

// kernel: generator32_forward.7
= control target key start
LH: loop header
LB: loop body
LE: loop exit
PB: predicated region body
PF: predicated region fallthrough
CT: control target
= control target key end

     0   :  { %s1765_s18 = smov 0   ;;  %s1998_s0 = inlined_call_operand.vmem [shape: f32[2,16,326], index: 0, kind: input, shape index: {}]   ;;  %s1999_s1 = inlined_call_operand.vmem [shape: f32[16,1], index: 1, kind: input, shape index: {}]   ;;  %s2000_s2 = inlined_call_operand.vmem [shape: f32[16,1], index: 2, kind: input, shape index: {}]   ;;  %s2001_s3 = inlined_call_operand.vmem [shape: f32[1,326], index: 3, kind: input, shape index: {}]   ;;  %s2002_s4 = inlined_call_operand.vmem [shape: f32[4,3,64], index: 4, kind: input, shape index: {}]   ;;  %s2003_s5 = inlined_call_operand.vmem [shape: f32[2,4,3,288], index: 5, kind: output, shape index: {}]  }
   0x1 LB: > { %s1248_s19 = sadd.s32 4294967295, %s1726_s18   ;;  %p1252_p0 = scmp.ge.s32.totalorder %s1726_s18, 1  ;;  %s1726_s18 = sphi %s1765_s18, %s15_s18  }
   0x2   : > { %p187_p1 = scmp.lt.s32.totalorder %s1726_s18, 3 }
   0x4   : > { %p188_p2 = pnand %p1252_p0, %p187_p1 }
   0x5   : > { %v249_v0 = vld [vmem:[%s2000_s2] sm:$0xff] (!%p188_p2)  ;;  %v1728_v2 = vmov (!%p188_p2), 0   ;;  %v250_v3 = vld [vmem:[%s2000_s2 + $0x8] sm:$0xff] (!%p188_p2)  ;;  %v1729_v5 = vmov (!%p188_p2), 0.0|0.0   ;;  %p215_p3 = scmp.lt.s32.totalorder (!%p188_p2), %s1248_s19, 1  ;;  %v275_v6 = vlaneseq (!%p188_p2)  ;;  %s1730_s9 = smov (!%p188_p2), 127  }
   0x6   : > { %191 = sbr.rel (%p188_p2) target bundleno = 669 (0x29d), region = 40  ;;  %v231_v1 = vld [vmem:[%s1999_s1] sm:$0xff] (!%p188_p2)  ;;  %1515 = vset.pattern.permute.xlu1 (!%p188_p2), %v1728_v2  ;;  %1514 = vset.pattern.permute.xlu0 (!%p188_p2), %v1728_v2  ;;  %v232_v4 = vld [vmem:[%s1999_s1 + $0x8] sm:$0xff] (!%p188_p2)  ;;  %s1731_s10 = smov (!%p188_p2), 110   ;;  %vm1733_vm0 = vmmov (!%p188_p2), 0   ;;  %v1734_v55 = vmov (!%p188_p2), 0.0  }
   0x7   : > { %253 = vperm.xlu1 (!%p188_p2), %1515, %v249_v0   ;;  %235 = vperm.xlu0 (!%p188_p2), %1514, %v231_v1   ;;  %v276_v7 = vshrl.u32 (!%p188_p2), %v275_v6, 7  ;;  %v273_v12 = vld [vmem:[%s2001_s3] sm:$0x7] (!%p188_p2)  ;;  %s1732_s11 = smov (!%p188_p2), 109   ;;  %vm314_vm1 = vcmask (!%p188_p2), 1039360   ;;  %vm337_vm2 = vcmask (!%p188_p2), 900096  }
   0x8   : > { %1402 = vmatprep.subr.bf16.mxu1 (!%p188_p2), %v1729_v5  ;;  %1326 = vmatprep.mubr.msk.f32.mxu1 (!%p188_p2), %vm1733_vm0, %v1734_v55  ;;  %vm360_vm3 = vcmask (!%p188_p2), 891904   ;;  %vm372_vm4 = vcmask (!%p188_p2), 523264   ;;  %vm525_vm5 = vcmask (!%p188_p2), 256000  }
   0x9   : > { %v281_v8 = vsub.s32 (!%p188_p2), 1, %v276_v7  ;;  %v285_v13 = vsub.s32 (!%p188_p2), 2, %v276_v7  ;;  %v277_v19 = vsub.s32 (!%p188_p2), 0, %v276_v7  ;;  %440 = vmatprep.mubr.f32.mxu0 (!%p188_p2), %v1734_v55 }
   0xb   : > { %258 = vperm.xlu1 (!%p188_p2), %1515, %v250_v3   ;;  %240 = vperm.xlu0 (!%p188_p2), %1514, %v232_v4   ;;  %v282_v20 = vrot.slane (!%p188_p2), %v273_v12, %v281_v8  ;;  %v286_v22 = vrot.slane (!%p188_p2), %v273_v12, %v285_v13  ;;  %v278_v32 = vrot.slane (!%p188_p2), %v273_v12, %v277_v19 }
   0xd   : > { %s2005_s19 = smov (!%p215_p3, %s1248_s19), 1 }
   0xe   : > { %s1498_s28 = smul.u32 48, %s2005_s19 }
  0x10   : > { %s219_s6 = scalar_lea.vmem %s1998_s0, %s1498_s28  ;;  %s1981_s24 = scalar_lea.vmem %s2003_s5, %s1498_s28 }
  0x11   : > { %v225_v9 = vld [vmem:[%s219_s6] sm:$0xff]  ;;  %v226_v10 = vld [vmem:[%s219_s6 + $0x8] sm:$0xff]  ;;  %v227_v11 = vld [vmem:[%s219_s6 + $0x10] sm:$0xff] }
  0x12   : > { %v228_v21 = vld [vmem:[%s219_s6 + $0x18] sm:$0xff]  ;;  %v229_v26 = vld [vmem:[%s219_s6 + $0x20] sm:$0xff]  ;;  %v230_v27 = vld [vmem:[%s219_s6 + $0x28] sm:$0xff] }
  0x86   : > { %v254_v14 = vpop.permute.xlu1 %253  ;;  %v236_v15 = vpop.permute.xlu0 %235 }
  0x87   : > { %v243_v16 = vmul.f32 %v236_v15, %v225_v9  ;;  %v244_v17 = vmul.f32 %v236_v15, %v226_v10  ;;  %v245_v18 = vmul.f32 %v236_v15, %v227_v11 }
  0x89   : > { %v261_v23 = vadd.f32 %v254_v14, %v243_v16  ;;  %v262_v24 = vadd.f32 %v254_v14, %v244_v17  ;;  %v263_v25 = vadd.f32 %v254_v14, %v245_v18 }
  0x8a   : > { %v241_v28 = vpop.permute.xlu0 %240  ;;  %v259_v33 = vpop.permute.xlu1 %258 }
  0x8b   : > { %v268_v29 = vmax.f32 %v262_v24, 0.0  ;;  %v269_v30 = vmax.f32 %v263_v25, 0.0  ;;  %v246_v31 = vmul.f32 %v241_v28, %v228_v21  ;;  %v247_v34 = vmul.f32 %v241_v28, %v229_v26 }
  0x8c   : > { %v248_v35 = vmul.f32 %v241_v28, %v230_v27  ;;  %v267_v36 = vmax.f32 %v261_v23, 0.0 }
  0x8d   : > { %v291_v37 = vmul.f32 %v282_v20, %v268_v29  ;;  %v292_v38 = vmul.f32 %v286_v22, %v269_v30  ;;  %v264_v39 = vadd.f32 %v259_v33, %v246_v31  ;;  %v265_v40 = vadd.f32 %v259_v33, %v247_v34 }
  0x8e   : > { %v266_v41 = vadd.f32 %v259_v33, %v248_v35  ;;  %v290_v46 = vmul.f32 %v278_v32, %v267_v36 }
  0x8f   : > { %v270_v42 = vmax.f32 %v264_v39, 0.0  ;;  %v1516_v43 = vpack.i.bf16 %v292_v38, %v291_v37  ;;  %v271_v44 = vmax.f32 %v265_v40, 0.0 }
  0x90   : > { %v272_v45 = vmax.f32 %v266_v41, 0.0 }
  0x91   : > { %v293_v47 = vmul.f32 %v278_v32, %v270_v42  ;;  %1517 = vrot.lane.b32.xlu0 %v1516_v43, %s1730_s9  ;;  %v294_v48 = vmul.f32 %v282_v20, %v271_v44 }
  0x92   : > { %v295_v49 = vmul.f32 %v286_v22, %v272_v45 }
  0x93   : > { %v1526_v50 = vpack.i.bf16 %v293_v47, %v290_v46  ;;  %v1388_v51 = vpack.c.bf16 %v293_v47, %v290_v46  ;;  %v1386_v53 = vpack.c.bf16 %v294_v48, %v291_v37 }
  0x94   : > { %v1521_v52 = vpack.i.bf16 %v295_v49, %v294_v48  ;;  %v1403_v54 = vpack.c.bf16 %v295_v49, %v292_v38 }
  0x95   : > { %1527 = vrot.lane.b32.xlu0 %v1526_v50, %s1730_s9  ;;  %1387 = vmatprep.subr.bf16.mxu0 %v1386_v53 }
  0x96   : > { %1522 = vrot.lane.b32.xlu1 %v1521_v52, %s1730_s9  ;;  %1404 = vmatpush3.bf16.msra.mxu1 %v1403_v54 }
  0x97   : > { %1389 = vmatpush1.bf16.msra.mxu0 %v1388_v51  ;;  %1405 = vmatprep.subr.bf16.mxu1 %v1729_v5 }
  0x99   : > { %1537 = vrot.lane.b32.xlu0 %v1521_v52, %s1731_s10 }
  0x9a   : > { %1532 = vrot.lane.b32.xlu1 %v1516_v43, %s1731_s10 }
  0x9d   : > { %1547 = vrot.lane.b32.xlu0 %v1516_v43, %s1732_s11 }
  0x9e   : > { %1542 = vrot.lane.b32.xlu1 %v1526_v50, %s1731_s10 }
  0xa1   : > { %1557 = vrot.lane.b32.xlu0 %v1526_v50, %s1732_s11  ;;  %v371_v50 = vld [vmem:[%s2002_s4] sm:$0x7] }
  0xa2   : > { %1552 = vrot.lane.b32.xlu1 %v1521_v52, %s1732_s11 }
 0x103   : > { %v1518_v56 = vpop.permute.xlu0 %1517 }
 0x104   : > { %v1520_v57 = vunpack.i.h.bf16 %v1518_v56  ;;  %v1519_v58 = vunpack.i.l.bf16 %v1518_v56 }
 0x106   : > { %v316_v59 = vsel %vm314_vm1, %v1519_v58, %v1520_v57 }
 0x107   : > { %v1528_v60 = vpop.permute.xlu0 %1527  ;;  %v1811_v61 = vpack.i.bf16 %v1520_v57, %v316_v59 }
 0x108   : > { %v1523_v62 = vpop.permute.xlu1 %1522  ;;  %v1530_v63 = vunpack.i.h.bf16 %v1528_v60  ;;  %v1529_v0 = vunpack.i.l.bf16 %v1528_v60 }
 0x109   : > { %v1525_v1 = vunpack.i.h.bf16 %v1523_v62  ;;  %v1524_v2 = vunpack.i.l.bf16 %v1523_v62  ;;  %1562 = vrot.lane.b32.xlu1 %v1811_v61, %s1730_s9 }
 0x10a   : > { %v315_v3 = vsel %vm314_vm1, %v1529_v0, %v1519_v58 }
 0x10b   : > { %v318_v4 = vsel %vm314_vm1, %v1524_v2, %v1525_v1  ;;  %v317_v6 = vsel %vm314_vm1, %v1530_v63, %v1524_v2  ;;  %v1538_v7 = vpop.permute.xlu0 %1537  ;;  %v1818_v8 = vpack.c.bf16 %v1525_v1, %v1520_v57 }
 0x10c   : > { %v1533_v9 = vpop.permute.xlu1 %1532  ;;  %v1540_v10 = vunpack.i.h.bf16 %v1538_v7  ;;  %v1539_v11 = vunpack.i.l.bf16 %v1538_v7  ;;  %v1820_v12 = vpack.i.bf16 %v1525_v1, %v318_v4  ;;  %v1822_v13 = vpack.i.bf16 %v317_v6, %v315_v3 }
 0x10d   : > { %v1535_v14 = vunpack.i.h.bf16 %v1533_v9  ;;  %v1534_v15 = vunpack.i.l.bf16 %v1533_v9  ;;  %1407 = vmatpush3.bf16.msra.mxu1 %v1818_v8  ;;  %v1390_v16 = vpack.c.bf16 %v318_v4, %v316_v59  ;;  %v1392_v17 = vpack.c.bf16 %v317_v6, %v315_v3 }
 0x10e   : > { %v341_v18 = vsel %vm337_vm2, %v1539_v11, %v1540_v10  ;;  %1567 = vrot.lane.b32.xlu0 %v1820_v12, %s1730_s9  ;;  %1572 = vrot.lane.b32.xlu1 %v1822_v13, %s1730_s9 }
 0x10f   : > { %v339_v19 = vsel %vm337_vm2, %v1534_v15, %v1535_v14  ;;  %1391 = vmatprep.subr.bf16.mxu0 %v1390_v16  ;;  %1408 = vmatprep.subr.bf16.mxu1 %v1729_v5  ;;  %v1548_v20 = vpop.permute.xlu0 %1547  ;;  %v1832_v21 = vpack.c.bf16 %v1540_v10, %v1535_v14  ;;  %v1834_v22 = vpack.i.bf16 %v1540_v10, %v341_v18 }
 0x110   : > { %1393 = vmatpush1.bf16.msra.mxu0 %v1392_v17  ;;  %v1543_v23 = vpop.permute.xlu1 %1542  ;;  %v1550_v24 = vunpack.i.h.bf16 %v1548_v20  ;;  %v1549_v25 = vunpack.i.l.bf16 %v1548_v20  ;;  %v1576_v26 = vpack.i.bf16 %v1535_v14, %v339_v19  ;;  %v1836_v27 = vpack.c.bf16 %v341_v18, %v339_v19 }
 0x111   : > { %v1545_v28 = vunpack.i.h.bf16 %v1543_v23  ;;  %v1544_v29 = vunpack.i.l.bf16 %v1543_v23  ;;  %1410 = vmatpush3.bf16.msra.mxu1 %v1832_v21 }
 0x112   : > { %v362_v30 = vsel %vm360_vm3, %v1549_v25, %v1550_v24  ;;  %1577 = vrot.lane.b32.xlu0 %v1576_v26, %s1730_s9  ;;  %1582 = vrot.lane.b32.xlu1 %v1834_v22, %s1730_s9 }
 0x113   : > { %v338_v31 = vsel %vm337_vm2, %v1544_v29, %v1534_v15  ;;  %v340_v32 = vsel %vm337_vm2, %v1545_v28, %v1539_v11  ;;  %1395 = vmatprep.subr.bf16.mxu0 %v1836_v27  ;;  %v1558_v33 = vpop.permute.xlu0 %1557  ;;  %v1591_v34 = vpack.i.bf16 %v1550_v24, %v362_v30  ;;  %1411 = vmatprep.subr.bf16.mxu1 %v1729_v5 }
 0x114   : > { %v1553_v35 = vpop.permute.xlu1 %1552  ;;  %v1560_v36 = vunpack.i.h.bf16 %v1558_v33  ;;  %v1559_v37 = vunpack.i.l.bf16 %v1558_v33  ;;  %v1586_v38 = vpack.i.bf16 %v340_v32, %v338_v31  ;;  %v1847_v39 = vpack.c.bf16 %v340_v32, %v338_v31 }
 0x115   : > { %v1555_v40 = vunpack.i.h.bf16 %v1553_v35  ;;  %v1554_v41 = vunpack.i.l.bf16 %v1553_v35 }
 0x116   : > { %v361_v42 = vsel %vm360_vm3, %v1559_v37, %v1549_v25  ;;  %1587 = vrot.lane.b32.xlu0 %v1586_v38, %s1730_s9  ;;  %1592 = vrot.lane.b32.xlu1 %v1591_v34, %s1730_s9 }
 0x117   : > { %v364_v43 = vsel %vm360_vm3, %v1554_v41, %v1555_v40  ;;  %v363_v44 = vsel %vm360_vm3, %v1560_v36, %v1554_v41  ;;  %1397 = vmatpush1.bf16.msra.mxu0 %v1847_v39  ;;  %v1855_v45 = vpack.c.bf16 %v1555_v40, %v1550_v24 }
 0x118   : > { %v1596_v46 = vpack.i.bf16 %v1555_v40, %v364_v43  ;;  %v1601_v47 = vpack.i.bf16 %v363_v44, %v361_v42  ;;  %v1857_v48 = vpack.c.bf16 %v364_v43, %v362_v30  ;;  %v1859_v49 = vpack.c.bf16 %v363_v44, %v361_v42 }
 0x119   : > { %1413 = vmatpush3.bf16.msra.mxu1 %v1855_v45 }
 0x11a   : > { %1597 = vrot.lane.b32.xlu0 %v1596_v46, %s1730_s9  ;;  %1602 = vrot.lane.b32.xlu1 %v1601_v47, %s1730_s9 }
 0x11b   : > { %1399 = vmatprep.subr.bf16.mxu0 %v1857_v48  ;;  %1430 = vmatprep.subr.bf16.mxu1 %v1729_v5 }
 0x11c   : > { %1401 = vmatpush1.bf16.msra.mxu0 %v1859_v49  ;;  %1327 = vmatmul.mubr.msk.f32.vlgmr.msra.gmra.mrb[0].mxu1 %vm372_vm4, %v371_v50 }
 0x11d   : > { %1415 = vmatprep.subr.bf16.mxu0 %v1390_v16  ;;  %1432 = vmatpush3.bf16.msra.mxu1 %v1818_v8 }
 0x11e   : > { %1607 = vrot.lane.b32.xlu0 %v1811_v61, %s1731_s10  ;;  %1612 = vrot.lane.b32.xlu1 %v1820_v12, %s1731_s10 }
 0x11f   : > { %1255 = vmatmul.mubr.msk.f32.vlgmr.msra.gmra.mrb[0].mxu0 %vm372_vm4, %v371_v50  ;;  %1433 = vmatprep.subr.bf16.mxu1 %v1729_v5 }
 0x120   : > { %1417 = vmatpush1.bf16.msra.mxu0 %v1392_v17  ;;  %1345 = vmatprep.mubr.msk.f32.mxu1 %vm1733_vm0, %v1734_v55 }
 0x121   : > { %662 = vmatprep.mubr.f32.mxu0 %v1734_v55 }
 0x122   : > { %1617 = vrot.lane.b32.xlu0 %v1822_v13, %s1731_s10  ;;  %1622 = vrot.lane.b32.xlu1 %v1576_v26, %s1731_s10 }
 0x126   : > { %1627 = vrot.lane.b32.xlu0 %v1834_v22, %s1731_s10  ;;  %1632 = vrot.lane.b32.xlu1 %v1586_v38, %s1731_s10 }
 0x12a   : > { %1637 = vrot.lane.b32.xlu0 %v1591_v34, %s1731_s10  ;;  %1642 = vrot.lane.b32.xlu1 %v1596_v46, %s1731_s10 }
 0x12e   : > { %1647 = vrot.lane.b32.xlu0 %v1601_v47, %s1731_s10  ;;  %1652 = vrot.lane.b32.xlu1 %v1811_v61, %s1732_s11 }
 0x132   : > { %1657 = vrot.lane.b32.xlu0 %v1820_v12, %s1732_s11  ;;  %1662 = vrot.lane.b32.xlu1 %v1822_v13, %s1732_s11 }
 0x136   : > { %1667 = vrot.lane.b32.xlu0 %v1576_v26, %s1732_s11  ;;  %1672 = vrot.lane.b32.xlu1 %v1834_v22, %s1732_s11 }
 0x13a   : > { %1677 = vrot.lane.b32.xlu0 %v1586_v38, %s1732_s11  ;;  %1682 = vrot.lane.b32.xlu1 %v1591_v34, %s1732_s11 }
 0x13e   : > { %1687 = vrot.lane.b32.xlu0 %v1596_v46, %s1732_s11  ;;  %1692 = vrot.lane.b32.xlu1 %v1601_v47, %s1732_s11  ;;  %v1257_v47 = vld [vmem:[%s2002_s4 + $0x4] sm:$0x7] }
 0x17b   : > { %v1563_v51 = vpop.permute.xlu1 %1562 }
 0x17c   : > { %v1565_v52 = vunpack.i.h.bf16 %v1563_v51  ;;  %v1564_v53 = vunpack.i.l.bf16 %v1563_v51 }
 0x17e   : > { %v566_v61 = vsel %vm314_vm1, %v1564_v53, %v1565_v52 }
 0x180   : > { %v1568_v54 = vpop.permute.xlu0 %1567  ;;  %v1573_v56 = vpop.permute.xlu1 %1572 }
 0x181   : > { %v1570_v57 = vunpack.i.h.bf16 %v1568_v54  ;;  %v1569_v58 = vunpack.i.l.bf16 %v1568_v54  ;;  %v1575_v59 = vunpack.i.h.bf16 %v1573_v56  ;;  %v1574_v60 = vunpack.i.l.bf16 %v1573_v56 }
 0x183   : > { %v1434_v62 = vpack.c.bf16 %v1570_v57, %v1565_v52  ;;  %v567_v63 = vsel %vm314_vm1, %v1575_v59, %v1569_v58  ;;  %v565_v0 = vsel %vm314_vm1, %v1574_v60, %v1564_v53  ;;  %v568_v1 = vsel %vm314_vm1, %v1569_v58, %v1570_v57 }
 0x184   : > { %v1420_v2 = vpack.c.bf16 %v567_v63, %v565_v0  ;;  %v1578_v3 = vpop.permute.xlu0 %1577  ;;  %v1583_v4 = vpop.permute.xlu1 %1582  ;;  %v1418_v6 = vpack.c.bf16 %v568_v1, %v566_v61 }
 0x185   : > { %v1580_v7 = vunpack.i.h.bf16 %v1578_v3  ;;  %v1579_v8 = vunpack.i.l.bf16 %v1578_v3  ;;  %v1585_v9 = vunpack.i.h.bf16 %v1583_v4  ;;  %v1584_v10 = vunpack.i.l.bf16 %v1583_v4  ;;  %1435 = vmatpush3.bf16.msra.mxu1 %v1434_v62 }
 0x186   : > { %1419 = vmatprep.subr.bf16.mxu0 %v1418_v6  ;;  %1436 = vmatprep.subr.bf16.mxu1 %v1729_v5 }
 0x187   : > { %v1437_v11 = vpack.c.bf16 %v1585_v9, %v1580_v7  ;;  %1421 = vmatpush1.bf16.msra.mxu0 %v1420_v2  ;;  %v570_v12 = vsel %vm314_vm1, %v1579_v8, %v1580_v7  ;;  %v572_v13 = vsel %vm314_vm1, %v1584_v10, %v1585_v9 }
 0x188   : > { %v1588_v14 = vpop.permute.xlu0 %1587  ;;  %v1593_v15 = vpop.permute.xlu1 %1592  ;;  %v1422_v16 = vpack.c.bf16 %v572_v13, %v570_v12 }
 0x189   : > { %v1590_v17 = vunpack.i.h.bf16 %v1588_v14  ;;  %v1589_v18 = vunpack.i.l.bf16 %v1588_v14  ;;  %1438 = vmatpush3.bf16.msra.mxu1 %v1437_v11  ;;  %v1595_v19 = vunpack.i.h.bf16 %v1593_v15  ;;  %v1594_v20 = vunpack.i.l.bf16 %v1593_v15 }
 0x18a   : > { %1423 = vmatprep.subr.bf16.mxu0 %v1422_v16  ;;  %1439 = vmatprep.subr.bf16.mxu1 %v1729_v5 }
 0x18b   : > { %v569_v22 = vsel %vm314_vm1, %v1589_v18, %v1579_v8  ;;  %v571_v23 = vsel %vm314_vm1, %v1590_v17, %v1584_v10  ;;  %v574_v32 = vsel %vm314_vm1, %v1594_v20, %v1595_v19 }
 0x18c   : > { %v1424_v24 = vpack.c.bf16 %v571_v23, %v569_v22  ;;  %v1598_v25 = vpop.permute.xlu0 %1597  ;;  %v1603_v26 = vpop.permute.xlu1 %1602 }
 0x18d   : > { %v1600_v28 = vunpack.i.h.bf16 %v1598_v25  ;;  %v1599_v29 = vunpack.i.l.bf16 %v1598_v25  ;;  %v1605_v30 = vunpack.i.h.bf16 %v1603_v26  ;;  %v1604_v31 = vunpack.i.l.bf16 %v1603_v26  ;;  %v1262_v26 = vld [vmem:[%s2002_s4 + $0x8] sm:$0x7] }
 0x18e   : > { %1425 = vmatpush1.bf16.msra.mxu0 %v1424_v24 }
 0x18f   : > { %v1440_v33 = vpack.c.bf16 %v1600_v28, %v1595_v19  ;;  %v575_v34 = vsel %vm314_vm1, %v1605_v30, %v1599_v29  ;;  %v573_v35 = vsel %vm314_vm1, %v1604_v31, %v1594_v20  ;;  %v576_v36 = vsel %vm314_vm1, %v1599_v29, %v1600_v28 }
 0x190   : > { %v1428_v37 = vpack.c.bf16 %v575_v34, %v573_v35  ;;  %v1608_v38 = vpop.permute.xlu0 %1607  ;;  %v1613_v40 = vpop.permute.xlu1 %1612  ;;  %v1426_v41 = vpack.c.bf16 %v576_v36, %v574_v32 }
 0x191   : > { %v1610_v42 = vunpack.i.h.bf16 %v1608_v38  ;;  %v1609_v43 = vunpack.i.l.bf16 %v1608_v38  ;;  %v1615_v44 = vunpack.i.h.bf16 %v1613_v40  ;;  %v1614_v46 = vunpack.i.l.bf16 %v1613_v40  ;;  %1441 = vmatpush3.bf16.msra.mxu1 %v1440_v33 }
 0x192   : > { %1427 = vmatprep.subr.bf16.mxu0 %v1426_v41  ;;  %1458 = vmatprep.subr.bf16.mxu1 %v1729_v5 }
 0x193   : > { %1429 = vmatpush1.bf16.msra.mxu0 %v1428_v37  ;;  %v788_v50 = vsel %vm337_vm2, %v1609_v43, %v1610_v42  ;;  %v790_v51 = vsel %vm337_vm2, %v1614_v46, %v1615_v44  ;;  %v1462_v60 = vpack.c.bf16 %v1615_v44, %v1610_v42 }
 0x194   : > { %v1618_v52 = vpop.permute.xlu0 %1617  ;;  %v1623_v53 = vpop.permute.xlu1 %1622  ;;  %1443 = vmatprep.subr.bf16.mxu0 %v1836_v27  ;;  %1346 = vmatmul.mubr.msk.f32.vlgmr.msra.gmra.mrb[2].mxu1 %vm372_vm4, %v1257_v47  ;;  %v1446_v59 = vpack.c.bf16 %v790_v51, %v788_v50 }
 0x195   : > { %v1620_v54 = vunpack.i.h.bf16 %v1618_v52  ;;  %v1619_v56 = vunpack.i.l.bf16 %v1618_v52  ;;  %1460 = vmatpush3.bf16.msra.mxu1 %v1832_v21  ;;  %1364 = vmatprep.mubr.msk.f32.mxu1 %vm1733_vm0, %v1734_v55  ;;  %v1625_v57 = vunpack.i.h.bf16 %v1623_v53  ;;  %v1624_v58 = vunpack.i.l.bf16 %v1623_v53 }
 0x196   : > { %1258 = vmatmul.mubr.msk.f32.vlgmr.msra.gmra.mrb[2].mxu0 %vm372_vm4, %v1257_v47  ;;  %1461 = vmatprep.subr.bf16.mxu1 %v1729_v5 }
 0x197   : > { %v787_v61 = vsel %vm337_vm2, %v1619_v56, %v1609_v43  ;;  %v789_v27 = vsel %vm337_vm2, %v1620_v54, %v1614_v46  ;;  %1445 = vmatpush1.bf16.msra.mxu0 %v1847_v39  ;;  %884 = vmatprep.mubr.f32.mxu0 %v1734_v55  ;;  %v792_v4 = vsel %vm337_vm2, %v1624_v58, %v1625_v57 }
 0x198   : > { %v1448_v21 = vpack.c.bf16 %v789_v27, %v787_v61  ;;  %v1628_v62 = vpop.permute.xlu0 %1627  ;;  %v1633_v63 = vpop.permute.xlu1 %1632  ;;  %1447 = vmatprep.subr.bf16.mxu0 %v1446_v59 }
 0x199   : > { %v1630_v0 = vunpack.i.h.bf16 %v1628_v62  ;;  %v1629_v1 = vunpack.i.l.bf16 %v1628_v62  ;;  %v1635_v2 = vunpack.i.h.bf16 %v1633_v63  ;;  %v1634_v3 = vunpack.i.l.bf16 %v1633_v63  ;;  %1463 = vmatpush3.bf16.msra.mxu1 %v1462_v60 }
 0x19a   : > { %1464 = vmatprep.subr.bf16.mxu1 %v1729_v5 }
 0x19b   : > { %v1465_v6 = vpack.c.bf16 %v1630_v0, %v1625_v57  ;;  %v793_v7 = vsel %vm337_vm2, %v1635_v2, %v1629_v1  ;;  %v791_v39 = vsel %vm337_vm2, %v1634_v3, %v1624_v58  ;;  %1449 = vmatpush1.bf16.msra.mxu0 %v1448_v21  ;;  %v794_v8 = vsel %vm337_vm2, %v1629_v1, %v1630_v0 }
 0x19c   : > { %v1452_v9 = vpack.c.bf16 %v793_v7, %v791_v39  ;;  %v1638_v10 = vpop.permute.xlu0 %1637  ;;  %v1643_v11 = vpop.permute.xlu1 %1642  ;;  %v1450_v12 = vpack.c.bf16 %v794_v8, %v792_v4 }
 0x19d   : > { %v1640_v13 = vunpack.i.h.bf16 %v1638_v10  ;;  %v1639_v14 = vunpack.i.l.bf16 %v1638_v10  ;;  %v1645_v15 = vunpack.i.h.bf16 %v1643_v11  ;;  %v1644_v16 = vunpack.i.l.bf16 %v1643_v11  ;;  %1466 = vmatpush3.bf16.msra.mxu1 %v1465_v6 }
 0x19e   : > { %1451 = vmatprep.subr.bf16.mxu0 %v1450_v12  ;;  %1467 = vmatprep.subr.bf16.mxu1 %v1729_v5  ;;  %v1267_v12 = vld [vmem:[%s2002_s4 + $0xc] sm:$0x7] }
 0x19f   : > { %v1468_v17 = vpack.c.bf16 %v1645_v15, %v1640_v13  ;;  %1453 = vmatpush1.bf16.msra.mxu0 %v1452_v9  ;;  %v796_v18 = vsel %vm337_vm2, %v1639_v14, %v1640_v13  ;;  %v798_v19 = vsel %vm337_vm2, %v1644_v16, %v1645_v15 }
 0x1a0   : > { %v1648_v20 = vpop.permute.xlu0 %1647  ;;  %v1653_v22 = vpop.permute.xlu1 %1652  ;;  %v1454_v23 = vpack.c.bf16 %v798_v19, %v796_v18 }
 0x1a1   : > { %v1650_v24 = vunpack.i.h.bf16 %v1648_v20  ;;  %v1649_v25 = vunpack.i.l.bf16 %v1648_v20  ;;  %1469 = vmatpush3.bf16.msra.mxu1 %v1468_v17  ;;  %v1655_v30 = vunpack.i.h.bf16 %v1653_v22  ;;  %v1654_v31 = vunpack.i.l.bf16 %v1653_v22 }
 0x1a2   : > { %1455 = vmatprep.subr.bf16.mxu0 %v1454_v23  ;;  %1486 = vmatprep.subr.bf16.mxu1 %v1729_v5 }
 0x1a3   : > { %v795_v28 = vsel %vm337_vm2, %v1649_v25, %v1639_v14  ;;  %v797_v29 = vsel %vm337_vm2, %v1650_v24, %v1644_v16  ;;  %v1010_v41 = vsel %vm360_vm3, %v1654_v31, %v1655_v30 }
 0x1a4   : > { %v1456_v32 = vpack.c.bf16 %v797_v29, %v795_v28  ;;  %v1658_v33 = vpop.permute.xlu0 %1657  ;;  %v1663_v34 = vpop.permute.xlu1 %1662  ;;  %1365 = vmatmul.mubr.msk.f32.vlgmr.msra.gmra.mrb[4].mxu1 %vm372_vm4, %v1262_v26 }
 0x1a5   : > { %v1660_v35 = vunpack.i.h.bf16 %v1658_v33  ;;  %v1659_v36 = vunpack.i.l.bf16 %v1658_v33  ;;  %v1665_v37 = vunpack.i.h.bf16 %v1663_v34  ;;  %v1664_v38 = vunpack.i.l.bf16 %v1663_v34  ;;  %1488 = vmatpush3.bf16.msra.mxu1 %v1855_v45  ;;  %1383 = vmatprep.mubr.msk.f32.mxu1 %vm1733_vm0, %v1734_v55 }
 0x1a6   : > { %1457 = vmatpush1.bf16.msra.mxu0 %v1456_v32  ;;  %1489 = vmatprep.subr.bf16.mxu1 %v1729_v5 }
 0x1a7   : > { %v1490_v40 = vpack.c.bf16 %v1660_v35, %v1655_v30  ;;  %1471 = vmatprep.subr.bf16.mxu0 %v1857_v48  ;;  %v1012_v42 = vsel %vm360_vm3, %v1659_v36, %v1660_v35  ;;  %v1011_v43 = vsel %vm360_vm3, %v1665_v37, %v1659_v36  ;;  %v1009_v44 = vsel %vm360_vm3, %v1664_v38, %v1654_v31 }
 0x1a8   : > { %v1668_v46 = vpop.permute.xlu0 %1667  ;;  %v1673_v47 = vpop.permute.xlu1 %1672  ;;  %v1474_v45 = vpack.c.bf16 %v1012_v42, %v1010_v41  ;;  %v1476_v57 = vpack.c.bf16 %v1011_v43, %v1009_v44 }
 0x1a9   : > { %v1670_v50 = vunpack.i.h.bf16 %v1668_v46  ;;  %v1669_v51 = vunpack.i.l.bf16 %v1668_v46  ;;  %v1675_v52 = vunpack.i.h.bf16 %v1673_v47  ;;  %v1674_v53 = vunpack.i.l.bf16 %v1673_v47  ;;  %1491 = vmatpush3.bf16.msra.mxu1 %v1490_v40  ;;  %1263 = vmatmul.mubr.msk.f32.vlgmr.msra.gmra.mrb[4].mxu0 %vm372_vm4, %v1262_v26 }
 0x1aa   : > { %1473 = vmatpush1.bf16.msra.mxu0 %v1859_v49  ;;  %1492 = vmatprep.subr.bf16.mxu1 %v1729_v5 }
 0x1ab   : > { %v1493_v48 = vpack.c.bf16 %v1675_v52, %v1670_v50  ;;  %1475 = vmatprep.subr.bf16.mxu0 %v1474_v45  ;;  %v1014_v54 = vsel %vm360_vm3, %v1669_v51, %v1670_v50  ;;  %v1016_v56 = vsel %vm360_vm3, %v1674_v53, %v1675_v52  ;;  %1106 = vmatprep.mubr.f32.mxu0 %v1734_v55 }
 0x1ac   : > { %v1678_v58 = vpop.permute.xlu0 %1677  ;;  %v1683_v59 = vpop.permute.xlu1 %1682  ;;  %v1478_v60 = vpack.c.bf16 %v1016_v56, %v1014_v54 }
 0x1ad   : > { %v1680_v61 = vunpack.i.h.bf16 %v1678_v58  ;;  %v1679_v27 = vunpack.i.l.bf16 %v1678_v58  ;;  %1494 = vmatpush3.bf16.msra.mxu1 %v1493_v48  ;;  %v1685_v21 = vunpack.i.h.bf16 %v1683_v59  ;;  %v1684_v62 = vunpack.i.l.bf16 %v1683_v59 }
 0x1ae   : > { %1477 = vmatpush1.bf16.msra.mxu0 %v1476_v57  ;;  %1495 = vmatprep.subr.bf16.mxu1 %v1729_v5 }
 0x1af   : > { %v1013_v49 = vsel %vm360_vm3, %v1679_v27, %v1669_v51  ;;  %v1015_v63 = vsel %vm360_vm3, %v1680_v61, %v1674_v53  ;;  %1479 = vmatprep.subr.bf16.mxu0 %v1478_v60  ;;  %v1018_v7 = vsel %vm360_vm3, %v1684_v62, %v1685_v21 }
 0x1b0   : > { %v1480_v0 = vpack.c.bf16 %v1015_v63, %v1013_v49  ;;  %v1688_v1 = vpop.permute.xlu0 %1687  ;;  %v1693_v55 = vpop.permute.xlu1 %1692 }
 0x1b1   : > { %v1690_v2 = vunpack.i.h.bf16 %v1688_v1  ;;  %v1689_v3 = vunpack.i.l.bf16 %v1688_v1  ;;  %v1695_v4 = vunpack.i.h.bf16 %v1693_v55  ;;  %v1694_v6 = vunpack.i.l.bf16 %v1693_v55 }
 0x1b2   : > { %1481 = vmatpush1.bf16.msra.mxu0 %v1480_v0 }
 0x1b3   : > { %v1496_v39 = vpack.c.bf16 %v1690_v2, %v1685_v21  ;;  %v1019_v8 = vsel %vm360_vm3, %v1695_v4, %v1689_v3  ;;  %v1017_v5 = vsel %vm360_vm3, %v1694_v6, %v1684_v62  ;;  %v1020_v9 = vsel %vm360_vm3, %v1689_v3, %v1690_v2 }
 0x1b4   : > { %v1484_v10 = vpack.c.bf16 %v1019_v8, %v1017_v5  ;;  %v1482_v11 = vpack.c.bf16 %v1020_v9, %v1018_v7 }
 0x1b5   : > { %1497 = vmatpush3.bf16.msra.mxu1 %v1496_v39 }
 0x1b6   : > { %1483 = vmatprep.subr.bf16.mxu0 %v1482_v11 }
 0x1b7   : > { %1485 = vmatpush1.bf16.msra.mxu0 %v1484_v10 }
 0x1b8   : > { %1384 = vmatmul.mubr.msk.f32.vlgmr.msra.gmra.mrb[6].mxu1 %vm372_vm4, %v1267_v12 }
 0x1ba   : > { %1268 = vmatmul.mubr.msk.f32.vlgmr.msra.gmra.mrb[6].mxu0 %vm372_vm4, %v1267_v12 }
 0x1ef   : > { %v513_v13 = vpop.f32.mrb[0].mxu1 }
 0x1f0   : > { %1696 = vtanh.f32 %v513_v13  ;;  %v1328_v14 = vpop.f32.mrb[1].mxu1 }
 0x1f2   : > { %v442_v15 = vpop.f32.mrb[0].mxu0 }
 0x1f3   : > { %1698 = vtanh.f32 %v442_v15  ;;  %v444_v16 = vpop.f32.mrb[1].mxu0 }
 0x1f4   : > { %1700 = vtanh.f32 %v444_v16 }
 0x1fa   : > { %v1697_v17 = vpop.eup %1696 }
 0x1fb   : > { %526 = vst.msk [vmem:[%s1981_s24 + $0x8] sm:$0x7] %vm525_vm5, %v1697_v17 }
 0x1fd   : > { %v1699_v18 = vpop.eup %1698 }
 0x1fe   : > { %v1701_v19 = vpop.eup %1700 }
 0x1ff   : > { %v522_v20 = vcombine.low %v1699_v18, %v1701_v19 }
 0x201   : > { %524 = vst [vmem:[%s1981_s24] sm:$0x77] %v522_v20 }
 0x267   : > { %v735_v22 = vpop.f32.mrb[2].mxu1 }
 0x268   : > { %1702 = vtanh.f32 %v735_v22  ;;  %v1347_v23 = vpop.f32.mrb[3].mxu1 }
 0x269   : > { %v664_v24 = vpop.f32.mrb[2].mxu0 }
 0x26a   : > { %1704 = vtanh.f32 %v664_v24  ;;  %v666_v25 = vpop.f32.mrb[3].mxu0 }
 0x26b   : > { %1706 = vtanh.f32 %v666_v25 }
 0x272   : > { %v1703_v26 = vpop.eup %1702 }
 0x273   : > { %1261 = vst.msk [vmem:[%s1981_s24 + $0x14] sm:$0x7] %vm525_vm5, %v1703_v26 }
 0x274   : > { %v1705_v28 = vpop.eup %1704 }
 0x275   : > { %v1707_v29 = vpop.eup %1706 }
 0x276   : > { %v744_v30 = vcombine.low %v1705_v28, %v1707_v29 }
 0x277   : > { %v957_v31 = vpop.f32.mrb[4].mxu1 }
 0x278   : > { %1260 = vst [vmem:[%s1981_s24 + $0xc] sm:$0x77] %v744_v30  ;;  %1708 = vtanh.f32 %v957_v31  ;;  %v1366_v32 = vpop.f32.mrb[5].mxu1 }
 0x27c   : > { %v886_v33 = vpop.f32.mrb[4].mxu0 }
 0x27d   : > { %1710 = vtanh.f32 %v886_v33  ;;  %v888_v34 = vpop.f32.mrb[5].mxu0 }
 0x27e   : > { %1712 = vtanh.f32 %v888_v34 }
 0x282   : > { %v1709_v35 = vpop.eup %1708 }
 0x283   : > { %1266 = vst.msk [vmem:[%s1981_s24 + $0x20] sm:$0x7] %vm525_vm5, %v1709_v35 }
 0x287   : > { %v1711_v36 = vpop.eup %1710 }
 0x288   : > { %v1713_v37 = vpop.eup %1712 }
 0x289   : > { %v966_v38 = vcombine.low %v1711_v36, %v1713_v37 }
 0x28b   : > { %1265 = vst [vmem:[%s1981_s24 + $0x18] sm:$0x77] %v966_v38  ;;  %v1179_v40 = vpop.f32.mrb[6].mxu1 }
 0x28c   : > { %1714 = vtanh.f32 %v1179_v40  ;;  %v1385_v41 = vpop.f32.mrb[7].mxu1 }
 0x28d   : > { %v1108_v42 = vpop.f32.mrb[6].mxu0 }
 0x28e   : > { %1716 = vtanh.f32 %v1108_v42  ;;  %v1110_v43 = vpop.f32.mrb[7].mxu0 }
 0x28f   : > { %1718 = vtanh.f32 %v1110_v43 }
 0x296   : > { %v1715_v44 = vpop.eup %1714 }
 0x297   : > { %1271 = vst.msk [vmem:[%s1981_s24 + $0x2c] sm:$0x7] %vm525_vm5, %v1715_v44 }
 0x298   : > { %v1717_v46 = vpop.eup %1716 }
 0x299   : > { %v1719_v47 = vpop.eup %1718 }
 0x29a   : > { %v1188_v45 = vcombine.low %v1717_v46, %v1719_v47 }
 0x29c   : > { %1270 = vst [vmem:[%s1981_s24 + $0x24] sm:$0x77] %v1188_v45 }
 0x29d PF: > { %s15_s18 = sadd.s32 1, %s1726_s18  }
 0x29e   : > { %p12_p4 = scmp.ge.s32.totalorder %s15_s18, 4  }
 0x2a0   :  { %14 = sbr.rel (!%p12_p4) target bundleno = 1 (0x1), region = 76 }

</bundles_post_ra>
